<compile_context>
chip_gen: v6e
topology: v6e:2x2x1
jax: 0.10.0
libtpu: 0.0.40
codegen_flags: <defaults>
</compile_context>

<pallas_src>
import functools

import jax
import jax.numpy as jnp
from jax.experimental import pallas as pl
from jax.experimental.pallas import tpu as pltpu

LN_EPS = 1e-5  # nn.LayerNorm default
LANE = 128


def _round_up(x, m):
    return pl.cdiv(x, m) * m


def _pad2(a, rows, cols):
    return jnp.pad(a, ((0, rows - a.shape[0]), (0, cols - a.shape[1])))


def _layernorm(h, gamma, beta, true_features):
    # h: (TM, Fpad) f32, padded lanes are exactly zero.
    # Single-pass stats with the TRUE feature count as divisor.
    inv_f = 1.0 / float(true_features)
    mu = jnp.sum(h, axis=-1, keepdims=True) * inv_f
    ex2 = jnp.sum(h * h, axis=-1, keepdims=True) * inv_f
    var = ex2 - mu * mu
    # gamma/beta are zero in the padded lanes -> padded lanes stay 0.
    return (h - mu) * jax.lax.rsqrt(var + LN_EPS) * gamma + beta


def point_decoder_kernel(
    x_ref,      # (TM, in_pad)
    w1_ref,     # (in_pad, out_pad)
    g1_ref,     # (1, out_pad)   LayerNorm gamma (ff1)
    b1_ref,     # (1, out_pad)   LayerNorm beta  (ff1)
    w2_ref,     # (out_pad, out_pad)
    g2_ref,     # (1, out_pad)
    b2_ref,     # (1, out_pad)
    w3_ref,     # (out_pad, nc_pad)
    b3_ref,     # (1, nc_pad)    final linear bias
    o_ref,      # (TM, nc_pad)
    *,
    true_features,
    mxu_dtype,
):
    x = x_ref[...]

    # ff1: Linear(no bias) -> LayerNorm -> ReLU
    h = jnp.dot(x.astype(mxu_dtype), w1_ref[...].astype(mxu_dtype),
                preferred_element_type=jnp.float32)
    h = _layernorm(h, g1_ref[...], b1_ref[...], true_features)
    h = jnp.maximum(h, 0.0)

    # ff2: Linear(no bias) -> LayerNorm -> ReLU
    h = jnp.dot(h.astype(mxu_dtype), w2_ref[...].astype(mxu_dtype),
                preferred_element_type=jnp.float32)
    h = _layernorm(h, g2_ref[...], b2_ref[...], true_features)
    h = jnp.maximum(h, 0.0)

    # final linear (with bias)
    out = jnp.dot(h.astype(mxu_dtype), w3_ref[...].astype(mxu_dtype),
                  preferred_element_type=jnp.float32) + b3_ref[...]
    o_ref[...] = out.astype(o_ref.dtype)


def prepare_params(params, *, weight_dtype=jnp.float32):
    """Zero-pad all parameter arrays to 128-lane boundaries (done once)."""
    in_f, out_f = params["w1"].shape
    num_classes = params["w3"].shape[1]
    in_p = _round_up(in_f, LANE)
    out_p = _round_up(out_f, LANE)
    nc_p = _round_up(num_classes, LANE)
    return {
        "w1": _pad2(params["w1"], in_p, out_p).astype(weight_dtype),
        "g1": _pad2(params["g1"], 1, out_p).astype(jnp.float32),
        "b1": _pad2(params["b1"], 1, out_p).astype(jnp.float32),
        "w2": _pad2(params["w2"], out_p, out_p).astype(weight_dtype),
        "g2": _pad2(params["g2"], 1, out_p).astype(jnp.float32),
        "b2": _pad2(params["b2"], 1, out_p).astype(jnp.float32),
        "w3": _pad2(params["w3"], out_p, nc_p).astype(weight_dtype),
        "b3": _pad2(params["b3"], 1, nc_p).astype(jnp.float32),
    }


@functools.partial(
    jax.jit,
    static_argnames=("out_features", "num_classes", "block_rows", "mxu_dtype"),
)
def point_decoder(x, padded_params, *, out_features, num_classes,
                  block_rows=256, mxu_dtype=jnp.float32):
    """x: (N, in_features) float32; padded_params: output of prepare_params."""
    n, in_f = x.shape
    in_p = padded_params["w1"].shape[0]
    out_p = padded_params["w1"].shape[1]
    nc_p = padded_params["w3"].shape[1]
    assert block_rows % 8 == 0

    # Pad rows up to a tile multiple and features up to the padded width.
    n_pad = _round_up(n, block_rows)
    x_p = jnp.pad(x.astype(jnp.float32), ((0, n_pad - n), (0, in_p - in_f)))

    grid = (n_pad // block_rows,)
    full = lambda shape: pl.BlockSpec(shape, lambda i: (0, 0))

    kernel = functools.partial(
        point_decoder_kernel, true_features=out_features, mxu_dtype=mxu_dtype
    )

    out_padded = pl.pallas_call(
        kernel,
        out_shape=jax.ShapeDtypeStruct((n_pad, nc_p), jnp.float32),
        grid_spec=pltpu.PrefetchScalarGridSpec(
            num_scalar_prefetch=0,
            grid=grid,
            in_specs=[
                pl.BlockSpec((block_rows, in_p), lambda i: (i, 0)),  # x tile
                full((in_p, out_p)),    # w1
                full((1, out_p)),       # gamma1
                full((1, out_p)),       # beta1
                full((out_p, out_p)),   # w2
                full((1, out_p)),       # gamma2
                full((1, out_p)),       # beta2
                full((out_p, nc_p)),    # w3
                full((1, nc_p)),        # b3
            ],
            out_specs=pl.BlockSpec((block_rows, nc_p), lambda i: (i, 0)),
        ),
        compiler_params=pltpu.CompilerParams(
            dimension_semantics=("parallel",),
        ),
    )(
        x_p,
        padded_params["w1"], padded_params["g1"], padded_params["b1"],
        padded_params["w2"], padded_params["g2"], padded_params["b2"],
        padded_params["w3"], padded_params["b3"],
    )

    return out_padded[:n, :num_classes]


def init_params(key, in_features, out_features, num_classes):
    """Deterministic parameter init mirroring the PyTorch module's shapes.

    Linear weights are stored transposed: (in, out).  kaiming_normal_
    (std = sqrt(2 / fan_in)) for the two FeedForward linears, uniform for the
    final linear, LayerNorm gamma=1 / beta=0.
    """
    k1, k2, k3, k4 = jax.random.split(key, 4)
    w1 = jax.random.normal(k1, (in_features, out_features), jnp.float32) * jnp.sqrt(
        2.0 / in_features
    )
    w2 = jax.random.normal(k2, (out_features, out_features), jnp.float32) * jnp.sqrt(
        2.0 / out_features
    )
    bound = 1.0 / jnp.sqrt(out_features)
    w3 = jax.random.uniform(
        k3, (out_features, num_classes), jnp.float32, minval=-bound, maxval=bound
    )
    b3 = jax.random.uniform(
        k4, (1, num_classes), jnp.float32, minval=-bound, maxval=bound
    )
    return {
        "w1": w1,
        "g1": jnp.ones((1, out_features), jnp.float32),
        "b1": jnp.zeros((1, out_features), jnp.float32),
        "w2": w2,
        "g2": jnp.ones((1, out_features), jnp.float32),
        "b2": jnp.zeros((1, out_features), jnp.float32),
        "w3": w3,
        "b3": b3,
    }


def point_decoder_ref(x, p):
    """Pure-JAX reference for sanity checking."""
    def ln(h):
        mu = jnp.mean(h, axis=-1, keepdims=True)
        var = jnp.mean((h - mu) ** 2, axis=-1, keepdims=True)
        return (h - mu) * jax.lax.rsqrt(var + LN_EPS)

    h = jnp.maximum(ln(x @ p["w1"]) * p["g1"] + p["b1"], 0.0)
    h = jnp.maximum(ln(h @ p["w2"]) * p["g2"] + p["b2"], 0.0)
    return h @ p["w3"] + p["b3"]


if __name__ == "__main__":
    # Small shapes consistent with the module: batch=2, points=8 -> N=16 rows,
    # in_features=32, out_features=64, num_classes=8.  dropout=0 (default), so
    # no dropout layer exists in the forward pass.
    key = jax.random.PRNGKey(0)
    kx, kp = jax.random.split(key)

    N, IN_F, OUT_F, NUM_CLASSES = 16, 32, 64, 8
    x = jax.random.normal(kx, (N, IN_F), jnp.float32)
    params = init_params(kp, IN_F, OUT_F, NUM_CLASSES)
    ref = point_decoder_ref(x, params)

    # f32 MXU path (safe on all generations, incl. v5e).
    padded_f32 = prepare_params(params, weight_dtype=jnp.float32)
    out = point_decoder(
        x, padded_f32, out_features=OUT_F, num_classes=NUM_CLASSES,
        block_rows=256, mxu_dtype=jnp.float32,
    )
    out = jax.block_until_ready(out)
    assert out.shape == (N, NUM_CLASSES)
    assert jnp.allclose(out, ref, atol=1e-4, rtol=1e-4), "f32 mismatch vs reference"

    # bf16-operand / f32-accumulate MXU path (preferred on v6e/v7x).
    padded_bf16 = prepare_params(params, weight_dtype=jnp.bfloat16)
    out_bf16 = point_decoder(
        x, padded_bf16, out_features=OUT_F, num_classes=NUM_CLASSES,
        block_rows=256, mxu_dtype=jnp.bfloat16,
    )
    out_bf16 = jax.block_until_ready(out_bf16)
    assert jnp.allclose(out_bf16, ref, atol=5e-2, rtol=5e-2), "bf16 mismatch vs reference"

    print("KERNEL_OK")
</pallas_src>

<mosaic_0001>
module attributes {stable_mosaic.version = 11 : i64} {
  func.func @point_decoder_kernel(%arg0: i32, %arg1: memref<256x128xf32, #tpu.memory_space<vmem>>, %arg2: memref<128x128xf32, #tpu.memory_space<vmem>>, %arg3: memref<1x128xf32, #tpu.memory_space<vmem>>, %arg4: memref<1x128xf32, #tpu.memory_space<vmem>>, %arg5: memref<128x128xf32, #tpu.memory_space<vmem>>, %arg6: memref<1x128xf32, #tpu.memory_space<vmem>>, %arg7: memref<1x128xf32, #tpu.memory_space<vmem>>, %arg8: memref<128x128xf32, #tpu.memory_space<vmem>>, %arg9: memref<1x128xf32, #tpu.memory_space<vmem>>, %arg10: memref<256x128xf32, #tpu.memory_space<vmem>>) attributes {dimension_semantics = [#tpu.dimension_semantics<parallel>], iteration_bounds = array<i64: 1>, scalar_prefetch = 0 : i64, scratch_operands = 0 : i64, tpu.core_type = #tpu.core_type<tc>, window_params = [{transform_indices = @transform_0, window_bounds = array<i64: 256, 128>}, {pipeline_mode = #tpu.pipeline_mode<synchronous>, transform_indices = @transform_1, window_bounds = array<i64: 128, 128>}, {pipeline_mode = #tpu.pipeline_mode<synchronous>, transform_indices = @transform_2, window_bounds = array<i64: 1, 128>}, {pipeline_mode = #tpu.pipeline_mode<synchronous>, transform_indices = @transform_3, window_bounds = array<i64: 1, 128>}, {pipeline_mode = #tpu.pipeline_mode<synchronous>, transform_indices = @transform_4, window_bounds = array<i64: 128, 128>}, {pipeline_mode = #tpu.pipeline_mode<synchronous>, transform_indices = @transform_5, window_bounds = array<i64: 1, 128>}, {pipeline_mode = #tpu.pipeline_mode<synchronous>, transform_indices = @transform_6, window_bounds = array<i64: 1, 128>}, {pipeline_mode = #tpu.pipeline_mode<synchronous>, transform_indices = @transform_7, window_bounds = array<i64: 128, 128>}, {pipeline_mode = #tpu.pipeline_mode<synchronous>, transform_indices = @transform_8, window_bounds = array<i64: 1, 128>}, {transform_indices = @transform_9, window_bounds = array<i64: 256, 128>}]} {
    %c0 = arith.constant 0 : index
    %c0_0 = arith.constant 0 : index
    %0 = vector.load %arg1[%c0, %c0_0] : memref<256x128xf32, #tpu.memory_space<vmem>>, vector<256x128xf32>
    %c0_1 = arith.constant 0 : index
    %c0_2 = arith.constant 0 : index
    %1 = vector.load %arg2[%c0_1, %c0_2] : memref<128x128xf32, #tpu.memory_space<vmem>>, vector<128x128xf32>
    %cst = arith.constant dense<0.000000e+00> : vector<256x128xf32>
    %2 = tpu.matmul %0, %1, %cst {dimension_numbers = #tpu.dot_dimension_numbers<[1], [0], [0], [1], [0, 0, 1, 1], [], []>} : vector<256x128xf32>, vector<128x128xf32>, vector<256x128xf32> -> vector<256x128xf32>
    %c0_3 = arith.constant 0 : index
    %c0_4 = arith.constant 0 : index
    %3 = vector.load %arg3[%c0_3, %c0_4] : memref<1x128xf32, #tpu.memory_space<vmem>>, vector<1x128xf32>
    %c0_5 = arith.constant 0 : index
    %c0_6 = arith.constant 0 : index
    %4 = vector.load %arg4[%c0_5, %c0_6] : memref<1x128xf32, #tpu.memory_space<vmem>>, vector<1x128xf32>
    %cst_7 = arith.constant dense<0.000000e+00> : vector<256xf32>
    %5 = vector.multi_reduction <add>, %2, %cst_7 [1] : vector<256x128xf32> to vector<256xf32>
    %6 = vector.shape_cast %5 : vector<256xf32> to vector<256x1xf32>
    %cst_8 = arith.constant 1.562500e-02 : f32
    %7 = vector.broadcast %cst_8 : f32 to vector<256x1xf32>
    %8 = arith.mulf %6, %7 : vector<256x1xf32>
    %9 = arith.mulf %2, %2 : vector<256x128xf32>
    %cst_9 = arith.constant dense<0.000000e+00> : vector<256xf32>
    %10 = vector.multi_reduction <add>, %9, %cst_9 [1] : vector<256x128xf32> to vector<256xf32>
    %11 = vector.shape_cast %10 : vector<256xf32> to vector<256x1xf32>
    %cst_10 = arith.constant 1.562500e-02 : f32
    %12 = vector.broadcast %cst_10 : f32 to vector<256x1xf32>
    %13 = arith.mulf %11, %12 : vector<256x1xf32>
    %14 = arith.mulf %8, %8 : vector<256x1xf32>
    %15 = arith.subf %13, %14 : vector<256x1xf32>
    %16 = vector.broadcast %8 : vector<256x1xf32> to vector<256x128xf32>
    %17 = arith.subf %2, %16 : vector<256x128xf32>
    %cst_11 = arith.constant 9.99999974E-6 : f32
    %18 = vector.broadcast %cst_11 : f32 to vector<256x1xf32>
    %19 = arith.addf %15, %18 : vector<256x1xf32>
    %20 = math.rsqrt %19 : vector<256x1xf32>
    %21 = vector.broadcast %20 : vector<256x1xf32> to vector<256x128xf32>
    %22 = arith.mulf %17, %21 : vector<256x128xf32>
    %23 = vector.broadcast %3 : vector<1x128xf32> to vector<256x128xf32>
    %24 = arith.mulf %22, %23 : vector<256x128xf32>
    %25 = vector.broadcast %4 : vector<1x128xf32> to vector<256x128xf32>
    %26 = arith.addf %24, %25 : vector<256x128xf32>
    %cst_12 = arith.constant 0.000000e+00 : f32
    %27 = vector.broadcast %cst_12 : f32 to vector<256x128xf32>
    %28 = arith.maximumf %26, %27 : vector<256x128xf32>
    %c0_13 = arith.constant 0 : index
    %c0_14 = arith.constant 0 : index
    %29 = vector.load %arg5[%c0_13, %c0_14] : memref<128x128xf32, #tpu.memory_space<vmem>>, vector<128x128xf32>
    %cst_15 = arith.constant dense<0.000000e+00> : vector<256x128xf32>
    %30 = tpu.matmul %28, %29, %cst_15 {dimension_numbers = #tpu.dot_dimension_numbers<[1], [0], [0], [1], [0, 0, 1, 1], [], []>} : vector<256x128xf32>, vector<128x128xf32>, vector<256x128xf32> -> vector<256x128xf32>
    %c0_16 = arith.constant 0 : index
    %c0_17 = arith.constant 0 : index
    %31 = vector.load %arg6[%c0_16, %c0_17] : memref<1x128xf32, #tpu.memory_space<vmem>>, vector<1x128xf32>
    %c0_18 = arith.constant 0 : index
    %c0_19 = arith.constant 0 : index
    %32 = vector.load %arg7[%c0_18, %c0_19] : memref<1x128xf32, #tpu.memory_space<vmem>>, vector<1x128xf32>
    %cst_20 = arith.constant dense<0.000000e+00> : vector<256xf32>
    %33 = vector.multi_reduction <add>, %30, %cst_20 [1] : vector<256x128xf32> to vector<256xf32>
    %34 = vector.shape_cast %33 : vector<256xf32> to vector<256x1xf32>
    %cst_21 = arith.constant 1.562500e-02 : f32
    %35 = vector.broadcast %cst_21 : f32 to vector<256x1xf32>
    %36 = arith.mulf %34, %35 : vector<256x1xf32>
    %37 = arith.mulf %30, %30 : vector<256x128xf32>
    %cst_22 = arith.constant dense<0.000000e+00> : vector<256xf32>
    %38 = vector.multi_reduction <add>, %37, %cst_22 [1] : vector<256x128xf32> to vector<256xf32>
    %39 = vector.shape_cast %38 : vector<256xf32> to vector<256x1xf32>
    %cst_23 = arith.constant 1.562500e-02 : f32
    %40 = vector.broadcast %cst_23 : f32 to vector<256x1xf32>
    %41 = arith.mulf %39, %40 : vector<256x1xf32>
    %42 = arith.mulf %36, %36 : vector<256x1xf32>
    %43 = arith.subf %41, %42 : vector<256x1xf32>
    %44 = vector.broadcast %36 : vector<256x1xf32> to vector<256x128xf32>
    %45 = arith.subf %30, %44 : vector<256x128xf32>
    %cst_24 = arith.constant 9.99999974E-6 : f32
    %46 = vector.broadcast %cst_24 : f32 to vector<256x1xf32>
    %47 = arith.addf %43, %46 : vector<256x1xf32>
    %48 = math.rsqrt %47 : vector<256x1xf32>
    %49 = vector.broadcast %48 : vector<256x1xf32> to vector<256x128xf32>
    %50 = arith.mulf %45, %49 : vector<256x128xf32>
    %51 = vector.broadcast %31 : vector<1x128xf32> to vector<256x128xf32>
    %52 = arith.mulf %50, %51 : vector<256x128xf32>
    %53 = vector.broadcast %32 : vector<1x128xf32> to vector<256x128xf32>
    %54 = arith.addf %52, %53 : vector<256x128xf32>
    %cst_25 = arith.constant 0.000000e+00 : f32
    %55 = vector.broadcast %cst_25 : f32 to vector<256x128xf32>
    %56 = arith.maximumf %54, %55 : vector<256x128xf32>
    %c0_26 = arith.constant 0 : index
    %c0_27 = arith.constant 0 : index
    %57 = vector.load %arg8[%c0_26, %c0_27] : memref<128x128xf32, #tpu.memory_space<vmem>>, vector<128x128xf32>
    %cst_28 = arith.constant dense<0.000000e+00> : vector<256x128xf32>
    %58 = tpu.matmul %56, %57, %cst_28 {dimension_numbers = #tpu.dot_dimension_numbers<[1], [0], [0], [1], [0, 0, 1, 1], [], []>} : vector<256x128xf32>, vector<128x128xf32>, vector<256x128xf32> -> vector<256x128xf32>
    %c0_29 = arith.constant 0 : index
    %c0_30 = arith.constant 0 : index
    %59 = vector.load %arg9[%c0_29, %c0_30] : memref<1x128xf32, #tpu.memory_space<vmem>>, vector<1x128xf32>
    %60 = vector.broadcast %59 : vector<1x128xf32> to vector<256x128xf32>
    %61 = arith.addf %58, %60 : vector<256x128xf32>
    %c0_31 = arith.constant 0 : index
    %c0_32 = arith.constant 0 : index
    %62 = vector.load %arg10[%c0_31, %c0_32] : memref<256x128xf32, #tpu.memory_space<vmem>>, vector<256x128xf32>
    tpu.vector_store %arg10[%c0_31, %c0_32], %61 {strides = array<i32>} : memref<256x128xf32, #tpu.memory_space<vmem>>, vector<256x128xf32>,
    return
  }
  func.func @transform_0(%arg0: i32) -> (i32, i32) {
    %c0_i32 = arith.constant 0 : i32
    %c0_i32_0 = arith.constant 0 : i32
    return %arg0, %c0_i32 : i32, i32
  }
  func.func @transform_1(%arg0: i32) -> (i32, i32) {
    %c0_i32 = arith.constant 0 : i32
    %c0_i32_0 = arith.constant 0 : i32
    %c0_i32_1 = arith.constant 0 : i32
    return %c0_i32, %c0_i32_0 : i32, i32
  }
  func.func @transform_2(%arg0: i32) -> (i32, i32) {
    %c0_i32 = arith.constant 0 : i32
    %c0_i32_0 = arith.constant 0 : i32
    %c0_i32_1 = arith.constant 0 : i32
    return %c0_i32, %c0_i32_0 : i32, i32
  }
  func.func @transform_3(%arg0: i32) -> (i32, i32) {
    %c0_i32 = arith.constant 0 : i32
    %c0_i32_0 = arith.constant 0 : i32
    %c0_i32_1 = arith.constant 0 : i32
    return %c0_i32, %c0_i32_0 : i32, i32
  }
  func.func @transform_4(%arg0: i32) -> (i32, i32) {
    %c0_i32 = arith.constant 0 : i32
    %c0_i32_0 = arith.constant 0 : i32
    %c0_i32_1 = arith.constant 0 : i32
    return %c0_i32, %c0_i32_0 : i32, i32
  }
  func.func @transform_5(%arg0: i32) -> (i32, i32) {
    %c0_i32 = arith.constant 0 : i32
    %c0_i32_0 = arith.constant 0 : i32
    %c0_i32_1 = arith.constant 0 : i32
    return %c0_i32, %c0_i32_0 : i32, i32
  }
  func.func @transform_6(%arg0: i32) -> (i32, i32) {
    %c0_i32 = arith.constant 0 : i32
    %c0_i32_0 = arith.constant 0 : i32
    %c0_i32_1 = arith.constant 0 : i32
    return %c0_i32, %c0_i32_0 : i32, i32
  }
  func.func @transform_7(%arg0: i32) -> (i32, i32) {
    %c0_i32 = arith.constant 0 : i32
    %c0_i32_0 = arith.constant 0 : i32
    %c0_i32_1 = arith.constant 0 : i32
    return %c0_i32, %c0_i32_0 : i32, i32
  }
  func.func @transform_8(%arg0: i32) -> (i32, i32) {
    %c0_i32 = arith.constant 0 : i32
    %c0_i32_0 = arith.constant 0 : i32
    %c0_i32_1 = arith.constant 0 : i32
    return %c0_i32, %c0_i32_0 : i32, i32
  }
  func.func @transform_9(%arg0: i32) -> (i32, i32) {
    %c0_i32 = arith.constant 0 : i32
    %c0_i32_0 = arith.constant 0 : i32
    return %arg0, %c0_i32 : i32, i32
  }
}

</mosaic_0001>

<bundles_post_ra>
// kernel: point_decoder.1
= control target key start
LH: loop header
LB: loop body
LE: loop exit
PB: predicated region body
PF: predicated region fallthrough
CT: control target
= control target key end

     0   :  { %14 = vsyncpa [#allocation3], 0  ;;  %s2471_s30 = smov [#allocation2]   ;;  %s3689_s0 = inlined_call_operand.vmem [shape: f32[256,128], index: 0, kind: input, shape index: {}]   ;;  %s3690_s1 = inlined_call_operand.vmem [shape: f32[128,128], index: 1, kind: input, shape index: {}]   ;;  %s3691_s2 = inlined_call_operand.vmem [shape: f32[1,128], index: 2, kind: input, shape index: {}]   ;;  %s3692_s3 = inlined_call_operand.vmem [shape: f32[1,128], index: 3, kind: input, shape index: {}]   ;;  %s3693_s4 = inlined_call_operand.vmem [shape: f32[128,128], index: 4, kind: input, shape index: {}]   ;;  %s3694_s5 = inlined_call_operand.vmem [shape: f32[1,128], index: 5, kind: input, shape index: {}]   ;;  %s3695_s6 = inlined_call_operand.vmem [shape: f32[1,128], index: 6, kind: input, shape index: {}]   ;;  %s3696_s7 = inlined_call_operand.hbm [shape: f32[128,128], index: 7, kind: input, shape index: {}]   ;;  %s3697_s8 = inlined_call_operand.vmem [shape: f32[1,128], index: 8, kind: input, shape index: {}]   ;;  %s3698_s9 = inlined_call_operand.vmem [shape: f32[256,128], index: 9, kind: output, shape index: {}]  }
   0x1   :  { %s34_s10 = sshll.u32 %s2471_s30, 4  ;;  %s35_s10 = int_to_ptr.vmem [resolvable:$true] %s34_s10 }
   0x2   :  { %s2457_s11 = scalar_lea.vmem %s35_s10, 2048  ;;  %p2462_p1 = scmp.lt.s32.totalorder %s35_s10, %s35_s10 }
   0x3   :  { %p2458_p0 = scmp.ne.s32.totalorder %s35_s10, %s2457_s11  ;;  %p2463_p2 = scmp.lt.s32.totalorder %s2457_s11, %s2457_s11 }
   0x5   :  { %p2464_p3 = por %p2463_p2, %p2462_p1 }
   0x7   :  { %p2465_p4 = pnand %p2464_p3, %p2458_p0 }
   0x9   :  { %2468 = shalt.err (!%p2465_p4)
}
   0xa   :  { %s2472_s12 = smov 128   ;;  %s2473_s13 = smov 8  }
   0xb   :  { %40 = dma.hbm_to_vmem [thread:$0]  %s3696_s7, 2048, %s35_s10, [#allocation3], %s2472_s12, %s2472_s12, %s2473_s13  }
   0xc   :  { %2469 = dma.done.wait [#allocation3], 2048  }
   0xd   :  { %2470 = vsyncadd [#allocation3], 4294965248  ;;  %v93_v0 = vld [vmem:[%s3690_s1 + $0x78] sm:$0xff]  ;;  %v92_v1 = vld [vmem:[%s3690_s1 + $0x70] sm:$0xff] }
   0xe   :  { %2046 = vmatprep.subr.mxu0 %v93_v0  ;;  %2286 = vmatprep.subr.mxu1 %v93_v0  ;;  %v91_v2 = vld [vmem:[%s3690_s1 + $0x68] sm:$0xff]  ;;  %v90_v3 = vld [vmem:[%s3690_s1 + $0x60] sm:$0xff]  ;;  %v89_v4 = vld [vmem:[%s3690_s1 + $0x58] sm:$0xff] }
   0xf   :  { %2047 = vmatpush3.msra.mxu0 %v93_v0  ;;  %2302 = vmatpush3.msra.mxu1 %v93_v0  ;;  %v88_v5 = vld [vmem:[%s3690_s1 + $0x50] sm:$0xff]  ;;  %v87_v6 = vld [vmem:[%s3690_s1 + $0x48] sm:$0xff]  ;;  %v86_v7 = vld [vmem:[%s3690_s1 + $0x40] sm:$0xff] }
  0x10   :  { %2048 = vmatprep.subr.mxu0 %v92_v1  ;;  %2287 = vmatprep.subr.mxu1 %v92_v1  ;;  %v85_v8 = vld [vmem:[%s3690_s1 + $0x38] sm:$0xff]  ;;  %v84_v9 = vld [vmem:[%s3690_s1 + $0x30] sm:$0xff]  ;;  %v83_v10 = vld [vmem:[%s3690_s1 + $0x28] sm:$0xff] }
  0x11   :  { %2049 = vmatpush3.msra.mxu0 %v92_v1  ;;  %2303 = vmatpush3.msra.mxu1 %v92_v1  ;;  %v82_v11 = vld [vmem:[%s3690_s1 + $0x20] sm:$0xff]  ;;  %v81_v12 = vld [vmem:[%s3690_s1 + $0x18] sm:$0xff]  ;;  %v80_v13 = vld [vmem:[%s3690_s1 + $0x10] sm:$0xff] }
  0x12   :  { %2050 = vmatprep.subr.mxu0 %v91_v2  ;;  %2288 = vmatprep.subr.mxu1 %v91_v2  ;;  %v79_v14 = vld [vmem:[%s3690_s1 + $0x8] sm:$0xff]  ;;  %v78_v15 = vld [vmem:[%s3690_s1] sm:$0xff]  ;;  %v48_v20 = vld [vmem:[%s3689_s0 + $0x10] sm:$0xff] }
  0x13   :  { %2051 = vmatpush3.msra.mxu0 %v91_v2  ;;  %2304 = vmatpush3.msra.mxu1 %v91_v2  ;;  %v46_v16 = vld [vmem:[%s3689_s0] sm:$0xff]  ;;  %v47_v18 = vld [vmem:[%s3689_s0 + $0x8] sm:$0xff]  ;;  %v64_v21 = vld [vmem:[%s3689_s0 + $0x90] sm:$0xff] }
  0x14   :  { %2052 = vmatprep.subr.mxu0 %v90_v3  ;;  %2289 = vmatprep.subr.mxu1 %v90_v3  ;;  %v62_v17 = vld [vmem:[%s3689_s0 + $0x80] sm:$0xff]  ;;  %v63_v19 = vld [vmem:[%s3689_s0 + $0x88] sm:$0xff]  ;;  %v49_v22 = vld [vmem:[%s3689_s0 + $0x18] sm:$0xff] }
  0x15   :  { %2053 = vmatpush3.msra.mxu0 %v90_v3  ;;  %2305 = vmatpush3.msra.mxu1 %v90_v3  ;;  %v65_v23 = vld [vmem:[%s3689_s0 + $0x98] sm:$0xff]  ;;  %v50_v24 = vld [vmem:[%s3689_s0 + $0x20] sm:$0xff]  ;;  %v51_v26 = vld [vmem:[%s3689_s0 + $0x28] sm:$0xff] }
  0x16   :  { %2054 = vmatprep.subr.mxu0 %v89_v4  ;;  %2290 = vmatprep.subr.mxu1 %v89_v4  ;;  %v66_v25 = vld [vmem:[%s3689_s0 + $0xa0] sm:$0xff]  ;;  %v67_v27 = vld [vmem:[%s3689_s0 + $0xa8] sm:$0xff]  ;;  %v52_v28 = vld [vmem:[%s3689_s0 + $0x30] sm:$0xff] }
  0x17   :  { %2055 = vmatpush3.msra.mxu0 %v89_v4  ;;  %2306 = vmatpush3.msra.mxu1 %v89_v4  ;;  %v68_v29 = vld [vmem:[%s3689_s0 + $0xb0] sm:$0xff]  ;;  %v53_v30 = vld [vmem:[%s3689_s0 + $0x38] sm:$0xff]  ;;  %v54_v32 = vld [vmem:[%s3689_s0 + $0x40] sm:$0xff] }
  0x18   :  { %2056 = vmatprep.subr.mxu0 %v88_v5  ;;  %2291 = vmatprep.subr.mxu1 %v88_v5  ;;  %v69_v31 = vld [vmem:[%s3689_s0 + $0xb8] sm:$0xff]  ;;  %v70_v33 = vld [vmem:[%s3689_s0 + $0xc0] sm:$0xff]  ;;  %v55_v34 = vld [vmem:[%s3689_s0 + $0x48] sm:$0xff] }
  0x19   :  { %2057 = vmatpush3.msra.mxu0 %v88_v5  ;;  %2307 = vmatpush3.msra.mxu1 %v88_v5  ;;  %v71_v35 = vld [vmem:[%s3689_s0 + $0xc8] sm:$0xff]  ;;  %v56_v36 = vld [vmem:[%s3689_s0 + $0x50] sm:$0xff]  ;;  %v57_v38 = vld [vmem:[%s3689_s0 + $0x58] sm:$0xff] }
  0x1a   :  { %2058 = vmatprep.subr.mxu0 %v87_v6  ;;  %2292 = vmatprep.subr.mxu1 %v87_v6  ;;  %v72_v37 = vld [vmem:[%s3689_s0 + $0xd0] sm:$0xff]  ;;  %v73_v39 = vld [vmem:[%s3689_s0 + $0xd8] sm:$0xff]  ;;  %v58_v40 = vld [vmem:[%s3689_s0 + $0x60] sm:$0xff] }
  0x1b   :  { %2059 = vmatpush3.msra.mxu0 %v87_v6  ;;  %2308 = vmatpush3.msra.mxu1 %v87_v6  ;;  %v74_v41 = vld [vmem:[%s3689_s0 + $0xe0] sm:$0xff]  ;;  %v59_v42 = vld [vmem:[%s3689_s0 + $0x68] sm:$0xff]  ;;  %v60_v44 = vld [vmem:[%s3689_s0 + $0x70] sm:$0xff] }
  0x1c   :  { %2060 = vmatprep.subr.mxu0 %v86_v7  ;;  %2293 = vmatprep.subr.mxu1 %v86_v7  ;;  %v75_v43 = vld [vmem:[%s3689_s0 + $0xe8] sm:$0xff]  ;;  %v76_v45 = vld [vmem:[%s3689_s0 + $0xf0] sm:$0xff]  ;;  %v61_v46 = vld [vmem:[%s3689_s0 + $0x78] sm:$0xff] }
  0x1d   :  { %2061 = vmatpush3.msra.mxu0 %v86_v7  ;;  %2309 = vmatpush3.msra.mxu1 %v86_v7  ;;  %v77_v47 = vld [vmem:[%s3689_s0 + $0xf8] sm:$0xff]  ;;  %v859_v61 = vld [vmem:[%s3693_s4 + $0x70] sm:$0xff]  ;;  %v858_v0 = vld [vmem:[%s3693_s4 + $0x68] sm:$0xff] }
  0x1e   :  { %2062 = vmatprep.subr.mxu0 %v85_v8  ;;  %2294 = vmatprep.subr.mxu1 %v85_v8  ;;  %v860_v59 = vld [vmem:[%s3693_s4 + $0x78] sm:$0xff]  ;;  %v857_v1 = vld [vmem:[%s3693_s4 + $0x60] sm:$0xff]  ;;  %v855_v6 = vld [vmem:[%s3693_s4 + $0x50] sm:$0xff] }
  0x1f   :  { %2063 = vmatpush3.msra.mxu0 %v85_v8  ;;  %2310 = vmatpush3.msra.mxu1 %v85_v8  ;;  %v856_v5 = vld [vmem:[%s3693_s4 + $0x58] sm:$0xff] }
  0x20   :  { %2064 = vmatprep.subr.mxu0 %v84_v9  ;;  %2295 = vmatprep.subr.mxu1 %v84_v9 }
  0x21   :  { %2065 = vmatpush3.msra.mxu0 %v84_v9  ;;  %2311 = vmatpush3.msra.mxu1 %v84_v9  ;;  %v854_v9 = vld [vmem:[%s3693_s4 + $0x48] sm:$0xff] }
  0x22   :  { %2066 = vmatprep.subr.mxu0 %v83_v10  ;;  %2296 = vmatprep.subr.mxu1 %v83_v10 }
  0x23   :  { %2067 = vmatpush3.msra.mxu0 %v83_v10  ;;  %2312 = vmatpush3.msra.mxu1 %v83_v10 }
  0x24   :  { %2068 = vmatprep.subr.mxu0 %v82_v11  ;;  %2297 = vmatprep.subr.mxu1 %v82_v11 }
  0x25   :  { %2069 = vmatpush3.msra.mxu0 %v82_v11  ;;  %2313 = vmatpush3.msra.mxu1 %v82_v11  ;;  %v853_v11 = vld [vmem:[%s3693_s4 + $0x40] sm:$0xff] }
  0x26   :  { %2070 = vmatprep.subr.mxu0 %v81_v12  ;;  %2298 = vmatprep.subr.mxu1 %v81_v12 }
  0x27   :  { %2071 = vmatpush3.msra.mxu0 %v81_v12  ;;  %2314 = vmatpush3.msra.mxu1 %v81_v12 }
  0x28   :  { %2072 = vmatprep.subr.mxu0 %v80_v13  ;;  %2299 = vmatprep.subr.mxu1 %v80_v13 }
  0x29   :  { %2073 = vmatpush3.msra.mxu0 %v80_v13  ;;  %2315 = vmatpush3.msra.mxu1 %v80_v13 }
  0x2a   :  { %2074 = vmatprep.subr.mxu0 %v79_v14  ;;  %2300 = vmatprep.subr.mxu1 %v79_v14 }
  0x2b   :  { %2075 = vmatpush3.msra.mxu0 %v79_v14  ;;  %2316 = vmatpush3.msra.mxu1 %v79_v14  ;;  %v852_v14 = vld [vmem:[%s3693_s4 + $0x38] sm:$0xff] }
  0x2c   :  { %2076 = vmatprep.subr.mxu0 %v78_v15  ;;  %2301 = vmatprep.subr.mxu1 %v78_v15 }
  0x2d   :  { %2077 = vmatpush3.msra.mxu0 %v78_v15  ;;  %2317 = vmatpush3.msra.mxu1 %v78_v15  ;;  %v851_v15 = vld [vmem:[%s3693_s4 + $0x30] sm:$0xff] }
  0x2e   :  { %2078 = vmatprep.mubr.f32.mxu0 %v46_v16  ;;  %2102 = vmatprep.mubr.f32.mxu1 %v62_v17 }
  0x2f   :  { %2079 = vmatmul.mubr.f32.vlgmr.msra.gmra.mxu0 %v47_v18  ;;  %2103 = vmatmul.mubr.f32.vlgmr.msra.gmra.mxu1 %v63_v19  ;;  %v850_v19 = vld [vmem:[%s3693_s4 + $0x28] sm:$0xff] }
  0x30   :  { %2081 = vmatprep.mubr.f32.mxu0 %v48_v20  ;;  %2105 = vmatprep.mubr.f32.mxu1 %v64_v21  ;;  %v849_v20 = vld [vmem:[%s3693_s4 + $0x20] sm:$0xff] }
  0x31   :  { %2126 = vmatprep.subr.mxu1 %v860_v59 }
  0x32   :  { %2127 = vmatpush3.msra.mxu1 %v860_v59 }
  0x33   :  { %2082 = vmatmul.mubr.f32.gmra.mxu0 %v49_v22  ;;  %2106 = vmatmul.mubr.f32.gmra.mxu1 %v65_v23  ;;  %v848_v23 = vld [vmem:[%s3693_s4 + $0x18] sm:$0xff] }
  0x34   :  { %2084 = vmatprep.mubr.f32.mxu0 %v50_v24  ;;  %2108 = vmatprep.mubr.f32.mxu1 %v66_v25  ;;  %v847_v25 = vld [vmem:[%s3693_s4 + $0x10] sm:$0xff] }
  0x35   :  { %2128 = vmatprep.subr.mxu1 %v859_v61 }
  0x36   :  { %2129 = vmatpush3.msra.mxu1 %v859_v61 }
  0x37   :  { %2085 = vmatmul.mubr.f32.gmra.mxu0 %v51_v26  ;;  %2109 = vmatmul.mubr.f32.gmra.mxu1 %v67_v27 }
  0x38   :  { %2087 = vmatprep.mubr.f32.mxu0 %v52_v28  ;;  %2111 = vmatprep.mubr.f32.mxu1 %v68_v29  ;;  %v846_v28 = vld [vmem:[%s3693_s4 + $0x8] sm:$0xff]  ;;  %v845_v29 = vld [vmem:[%s3693_s4] sm:$0xff] }
  0x39   :  { %2130 = vmatprep.subr.mxu1 %v858_v0 }
  0x3a   :  { %2131 = vmatpush3.msra.mxu1 %v858_v0 }
  0x3b   :  { %2088 = vmatmul.mubr.f32.gmra.mxu0 %v53_v30  ;;  %2112 = vmatmul.mubr.f32.gmra.mxu1 %v69_v31 }
  0x3c   :  { %2090 = vmatprep.mubr.f32.mxu0 %v54_v32  ;;  %2114 = vmatprep.mubr.f32.mxu1 %v70_v33 }
  0x3d   :  { %2132 = vmatprep.subr.mxu1 %v857_v1 }
  0x3e   :  { %2133 = vmatpush3.msra.mxu1 %v857_v1 }
  0x3f   :  { %2091 = vmatmul.mubr.f32.gmra.mxu0 %v55_v34  ;;  %2115 = vmatmul.mubr.f32.gmra.mxu1 %v71_v35 }
  0x40   :  { %2093 = vmatprep.mubr.f32.mxu0 %v56_v36  ;;  %2117 = vmatprep.mubr.f32.mxu1 %v72_v37 }
  0x41   :  { %2134 = vmatprep.subr.mxu1 %v856_v5 }
  0x42   :  { %2135 = vmatpush3.msra.mxu1 %v856_v5 }
  0x43   :  { %2094 = vmatmul.mubr.f32.gmra.mxu0 %v57_v38  ;;  %2118 = vmatmul.mubr.f32.gmra.mxu1 %v73_v39 }
  0x44   :  { %2096 = vmatprep.mubr.f32.mxu0 %v58_v40  ;;  %2120 = vmatprep.mubr.f32.mxu1 %v74_v41 }
  0x45   :  { %2136 = vmatprep.subr.mxu1 %v855_v6 }
  0x46   :  { %2137 = vmatpush3.msra.mxu1 %v855_v6 }
  0x47   :  { %2097 = vmatmul.mubr.f32.gmra.mxu0 %v59_v42  ;;  %2121 = vmatmul.mubr.f32.gmra.mxu1 %v75_v43 }
  0x48   :  { %2099 = vmatprep.mubr.f32.mxu0 %v60_v44  ;;  %2123 = vmatprep.mubr.f32.mxu1 %v76_v45 }
  0x49   :  { %2138 = vmatprep.subr.mxu1 %v854_v9 }
  0x4a   :  { %2139 = vmatpush3.msra.mxu1 %v854_v9 }
  0x4b   :  { %2100 = vmatmul.mubr.f32.gmra.mxu0 %v61_v46  ;;  %2124 = vmatmul.mubr.f32.gmra.mxu1 %v77_v47 }
  0x4c   :  { %2140 = vmatprep.subr.mxu1 %v853_v11 }
  0x4d   :  { %2141 = vmatpush3.msra.mxu1 %v853_v11 }
  0x4e   :  { %2142 = vmatprep.subr.mxu1 %v852_v14 }
  0x4f   :  { %2143 = vmatpush3.msra.mxu1 %v852_v14 }
  0x50   :  { %2144 = vmatprep.subr.mxu1 %v851_v15 }
  0x51   :  { %2145 = vmatpush3.msra.mxu1 %v851_v15 }
  0x52   :  { %2146 = vmatprep.subr.mxu1 %v850_v19 }
  0x53   :  { %2147 = vmatpush3.msra.mxu1 %v850_v19 }
  0x54   :  { %2148 = vmatprep.subr.mxu1 %v849_v20 }
  0x55   :  { %2149 = vmatpush3.msra.mxu1 %v849_v20 }
  0x56   :  { %2150 = vmatprep.subr.mxu1 %v848_v23 }
  0x57   :  { %2151 = vmatpush3.msra.mxu1 %v848_v23 }
  0x58   :  { %2152 = vmatprep.subr.mxu1 %v847_v25 }
  0x59   :  { %2153 = vmatpush3.msra.mxu1 %v847_v25 }
  0x5a   :  { %2154 = vmatprep.subr.mxu1 %v846_v28 }
  0x5b   :  { %2155 = vmatpush3.msra.mxu1 %v846_v28 }
  0x5c   :  { %2156 = vmatprep.subr.mxu1 %v845_v29 }
  0x5d   :  { %2157 = vmatpush3.msra.mxu1 %v845_v29 }
  0xef   :  { %v2671_v48 = vpop.f32.mrf.mxu0  ;;  %v2673_v49 = vpop.f32.mrf.mxu1 }
  0xf0   :  { %355 = vadd.xlane.f32.xlu1 %v2673_v49  ;;  %323 = vadd.xlane.f32.xlu0 %v2671_v48  ;;  %v418_v50 = vmul.f32 %v2671_v48, %v2671_v48  ;;  %v434_v52 = vmul.f32 %v2673_v49, %v2673_v49 }
  0xf1   :  { %v2679_v51 = vpop.f32.mrf.mxu0  ;;  %v2684_v53 = vpop.f32.mrf.mxu1 }
  0xf2   :  { %v433_v54 = vmul.f32 %v2684_v53, %v2684_v53  ;;  %v417_v55 = vmul.f32 %v2679_v51, %v2679_v51 }
  0xf3   :  { %v2691_v56 = vpop.f32.mrf.mxu0  ;;  %v2695_v58 = vpop.f32.mrf.mxu1 }
  0xf4   :  { %451 = vadd.xlane.f32.xlu1 %v418_v50  ;;  %321 = vadd.xlane.f32.xlu0 %v2679_v51  ;;  %v420_v62 = vmul.f32 %v2691_v56, %v2691_v56  ;;  %v436_v2 = vmul.f32 %v2695_v58, %v2695_v58 }
  0xf5   :  { %v2693_v57 = vpop.f32.mrf.mxu0  ;;  %v2702_v60 = vpop.f32.mrf.mxu1 }
  0xf6   :  { %v419_v63 = vmul.f32 %v2693_v57, %v2693_v57  ;;  %v435_v3 = vmul.f32 %v2702_v60, %v2702_v60 }
  0xf7   :  { %v2723_v4 = vpop.f32.mrf.mxu0  ;;  %v2733_v8 = vpop.f32.mrf.mxu1 }
  0xf8   :  { %483 = vadd.xlane.f32.xlu1 %v434_v52  ;;  %353 = vadd.xlane.f32.xlu0 %v2684_v53  ;;  %v422_v12 = vmul.f32 %v2723_v4, %v2723_v4  ;;  %v438_v16 = vmul.f32 %v2733_v8, %v2733_v8 }
  0xf9   :  { %v2731_v7 = vpop.f32.mrf.mxu0  ;;  %v2740_v10 = vpop.f32.mrf.mxu1 }
  0xfa   :  { %v421_v13 = vmul.f32 %v2731_v7, %v2731_v7  ;;  %v437_v17 = vmul.f32 %v2740_v10, %v2740_v10 }
  0xfb   :  { %v2761_v18 = vpop.f32.mrf.mxu0  ;;  %v2771_v22 = vpop.f32.mrf.mxu1 }
  0xfc   :  { %481 = vadd.xlane.f32.xlu0 %v433_v54  ;;  %449 = vadd.xlane.f32.xlu1 %v417_v55  ;;  %v424_v26 = vmul.f32 %v2761_v18, %v2761_v18  ;;  %v440_v30 = vmul.f32 %v2771_v22, %v2771_v22 }
  0xfd   :  { %v2769_v21 = vpop.f32.mrf.mxu0  ;;  %v2778_v24 = vpop.f32.mrf.mxu1 }
  0xfe   :  { %v423_v27 = vmul.f32 %v2769_v21, %v2769_v21  ;;  %v439_v31 = vmul.f32 %v2778_v24, %v2778_v24 }
  0xff   :  { %v2799_v32 = vpop.f32.mrf.mxu0  ;;  %v2835_v46 = vpop.f32.mrf.mxu1 }
 0x100   :  { %327 = vadd.xlane.f32.xlu1 %v2691_v56  ;;  %325 = vadd.xlane.f32.xlu0 %v2693_v57  ;;  %v426_v34 = vmul.f32 %v2799_v32, %v2799_v32  ;;  %3707 = vst [vmem:[#allocation5_spill] sm:$0xff] %v2835_v46  ;;  %v442_v54 = vmul.f32 %v2835_v46, %v2835_v46 }
 0x101   :  { %v2801_v33 = vpop.f32.mrf.mxu0  ;;  %v2841_v52 = vpop.f32.mrf.mxu1 }
 0x102   :  { %v425_v35 = vmul.f32 %v2801_v33, %v2801_v33  ;;  %3708 = vst [vmem:[#allocation6_spill] sm:$0xff] %v2841_v52  ;;  %v441_v55 = vmul.f32 %v2841_v52, %v2841_v52 }
 0x103   :  { %v2809_v36 = vpop.f32.mrf.mxu0  ;;  %v2849_v59 = vpop.f32.mrf.mxu1 }
 0x104   :  { %359 = vadd.xlane.f32.xlu1 %v2695_v58  ;;  %357 = vadd.xlane.f32.xlu0 %v2702_v60  ;;  %v428_v38 = vmul.f32 %v2809_v36, %v2809_v36  ;;  %3709 = vst [vmem:[#allocation7_spill] sm:$0xff] %v2849_v59 }
 0x105   :  { %v2811_v37 = vpop.f32.mrf.mxu0  ;;  %v2851_v61 = vpop.f32.mrf.mxu1 }
 0x106   :  { %v427_v39 = vmul.f32 %v2811_v37, %v2811_v37  ;;  %3710 = vst [vmem:[#allocation8_spill] sm:$0xff] %v2851_v61 }
 0x107   :  { %v2819_v40 = vpop.f32.mrf.mxu0  ;;  %v2859_v0 = vpop.f32.mrf.mxu1 }
 0x108   :  { %455 = vadd.xlane.f32.xlu1 %v420_v62  ;;  %453 = vadd.xlane.f32.xlu0 %v419_v63  ;;  %v430_v42 = vmul.f32 %v2819_v40, %v2819_v40  ;;  %v444_v62 = vmul.f32 %v2849_v59, %v2849_v59  ;;  %v443_v63 = vmul.f32 %v2851_v61, %v2851_v61 }
 0x109   :  { %v2821_v41 = vpop.f32.mrf.mxu0  ;;  %3711 = vst [vmem:[#allocation9_spill] sm:$0xff] %v2859_v0  ;;  %v2861_v1 = vpop.f32.mrf.mxu1 }
 0x10a   :  { %v429_v43 = vmul.f32 %v2821_v41, %v2821_v41  ;;  %3712 = vst [vmem:[#allocation10_spill] sm:$0xff] %v2861_v1 }
 0x10b   :  { %v2829_v44 = vpop.f32.mrf.mxu0  ;;  %v2869_v5 = vpop.f32.mrf.mxu1 }
 0x10c   :  { %487 = vadd.xlane.f32.xlu1 %v436_v2  ;;  %485 = vadd.xlane.f32.xlu0 %v435_v3  ;;  %v432_v47 = vmul.f32 %v2829_v44, %v2829_v44  ;;  %v446_v2 = vmul.f32 %v2859_v0, %v2859_v0  ;;  %v445_v3 = vmul.f32 %v2861_v1, %v2861_v1 }
 0x10d   :  { %v2831_v45 = vpop.f32.mrf.mxu0  ;;  %3713 = vst [vmem:[#allocation11_spill] sm:$0xff] %v2869_v5  ;;  %v2871_v6 = vpop.f32.mrf.mxu1  ;;  %v448_v9 = vmul.f32 %v2869_v5, %v2869_v5 }
 0x10e   :  { %v431_v50 = vmul.f32 %v2831_v45, %v2831_v45  ;;  %3714 = vst [vmem:[#allocation12_spill] sm:$0xff] %v2871_v6  ;;  %v447_v11 = vmul.f32 %v2871_v6, %v2871_v6 }
 0x110   :  { %331 = vadd.xlane.f32.xlu1 %v2723_v4  ;;  %329 = vadd.xlane.f32.xlu0 %v2731_v7 }
 0x114   :  { %363 = vadd.xlane.f32.xlu1 %v2733_v8  ;;  %361 = vadd.xlane.f32.xlu0 %v2740_v10 }
 0x118   :  { %459 = vadd.xlane.f32.xlu1 %v422_v12  ;;  %457 = vadd.xlane.f32.xlu0 %v421_v13 }
 0x11c   :  { %491 = vadd.xlane.f32.xlu1 %v438_v16  ;;  %489 = vadd.xlane.f32.xlu0 %v437_v17 }
 0x120   :  { %335 = vadd.xlane.f32.xlu1 %v2761_v18  ;;  %333 = vadd.xlane.f32.xlu0 %v2769_v21 }
 0x124   :  { %367 = vadd.xlane.f32.xlu1 %v2771_v22  ;;  %365 = vadd.xlane.f32.xlu0 %v2778_v24 }
 0x128   :  { %463 = vadd.xlane.f32.xlu1 %v424_v26  ;;  %461 = vadd.xlane.f32.xlu0 %v423_v27 }
 0x12c   :  { %495 = vadd.xlane.f32.xlu1 %v440_v30  ;;  %493 = vadd.xlane.f32.xlu0 %v439_v31 }
 0x130   :  { %339 = vadd.xlane.f32.xlu1 %v2799_v32  ;;  %337 = vadd.xlane.f32.xlu0 %v2801_v33 }
 0x134   :  { %467 = vadd.xlane.f32.xlu1 %v426_v34  ;;  %465 = vadd.xlane.f32.xlu0 %v425_v35 }
 0x138   :  { %343 = vadd.xlane.f32.xlu1 %v2809_v36  ;;  %341 = vadd.xlane.f32.xlu0 %v2811_v37 }
 0x13c   :  { %471 = vadd.xlane.f32.xlu1 %v428_v38  ;;  %469 = vadd.xlane.f32.xlu0 %v427_v39 }
 0x140   :  { %347 = vadd.xlane.f32.xlu1 %v2819_v40  ;;  %345 = vadd.xlane.f32.xlu0 %v2821_v41 }
 0x144   :  { %475 = vadd.xlane.f32.xlu1 %v430_v42  ;;  %473 = vadd.xlane.f32.xlu0 %v429_v43 }
 0x148   :  { %351 = vadd.xlane.f32.xlu1 %v2829_v44  ;;  %349 = vadd.xlane.f32.xlu0 %v2831_v45 }
 0x14c   :  { %479 = vadd.xlane.f32.xlu1 %v432_v47  ;;  %477 = vadd.xlane.f32.xlu0 %v431_v50 }
 0x150   :  { %371 = vadd.xlane.f32.xlu1 %v2835_v46  ;;  %369 = vadd.xlane.f32.xlu0 %v2841_v52 }
 0x154   :  { %499 = vadd.xlane.f32.xlu1 %v442_v54  ;;  %497 = vadd.xlane.f32.xlu0 %v441_v55 }
 0x158   :  { %375 = vadd.xlane.f32.xlu1 %v2849_v59  ;;  %373 = vadd.xlane.f32.xlu0 %v2851_v61 }
 0x15c   :  { %503 = vadd.xlane.f32.xlu1 %v444_v62  ;;  %501 = vadd.xlane.f32.xlu0 %v443_v63 }
 0x160   :  { %379 = vadd.xlane.f32.xlu1 %v2859_v0  ;;  %377 = vadd.xlane.f32.xlu0 %v2861_v1 }
 0x164   :  { %507 = vadd.xlane.f32.xlu1 %v446_v2  ;;  %505 = vadd.xlane.f32.xlu0 %v445_v3 }
 0x168   :  { %383 = vadd.xlane.f32.xlu1 %v2869_v5  ;;  %381 = vadd.xlane.f32.xlu0 %v2871_v6 }
 0x16c   :  { %511 = vadd.xlane.f32.xlu1 %v448_v9  ;;  %509 = vadd.xlane.f32.xlu0 %v447_v11 }
 0x179   :  { %v2879_v12 = vpop.xlane.xlu1 %355  ;;  %v324_v13 = vpop.xlane.xlu0 %323 }
 0x17a   :  { %v386_v14 = vmul.f32 0.015625, %v324_v13 }
 0x17c   :  { %v546_v17 = vmul.f32 %v386_v14, %v386_v14  ;;  %v610_v11 = vsub.f32 %v2671_v48, %v386_v14 }
 0x17d   :  { %v452_v15 = vpop.xlane.xlu1 %451  ;;  %v322_v16 = vpop.xlane.xlu0 %321 }
 0x17e   :  { %v514_v19 = vmul.f32 0.015625, %v452_v15  ;;  %v385_v27 = vmul.f32 0.015625, %v322_v16 }
 0x180   :  { %v578_v20 = vsub.f32 %v514_v19, %v546_v17  ;;  %v545_v30 = vmul.f32 %v385_v27, %v385_v27 }
 0x181   :  { %v2881_v23 = vpop.xlane.xlu1 %483  ;;  %v2883_v25 = vpop.xlane.xlu0 %353 }
 0x182   :  { %v642_v26 = vadd.f32 1e-05, %v578_v20 }
 0x184   :  { %2321 = vrsqrt.f32 %v642_v26 }
 0x185   :  { %v2885_v28 = vpop.xlane.xlu0 %481  ;;  %v450_v29 = vpop.xlane.xlu1 %449 }
 0x186   :  { %v513_v31 = vmul.f32 0.015625, %v450_v29  ;;  %v2899_v29 = vld [vmem:[%s3691_s2] ss:$0 sm:$0xff] }
 0x188   :  { %v577_v34 = vsub.f32 %v513_v31, %v545_v30  ;;  %v609_v30 = vsub.f32 %v2679_v51, %v385_v27 }
 0x189   :  { %v328_v35 = vpop.xlane.xlu1 %327  ;;  %v326_v38 = vpop.xlane.xlu0 %325 }
 0x18a   :  { %v641_v39 = vadd.f32 1e-05, %v577_v34  ;;  %v388_v47 = vmul.f32 0.015625, %v328_v35  ;;  %v387_v50 = vmul.f32 0.015625, %v326_v38  ;;  %v2906_v35 = vld [vmem:[%s3692_s3] ss:$0 sm:$0xff] }
 0x18c   :  { %2323 = vrsqrt.f32 %v641_v39  ;;  %v548_v63 = vmul.f32 %v388_v47, %v388_v47  ;;  %v547_v2 = vmul.f32 %v387_v50, %v387_v50 }
 0x18d   :  { %v2887_v42 = vpop.xlane.xlu1 %359  ;;  %v2889_v43 = vpop.xlane.xlu0 %357 }
 0x191   :  { %v456_v54 = vpop.xlane.xlu1 %455  ;;  %v454_v55 = vpop.xlane.xlu0 %453 }
 0x192   :  { %v2322_v62 = vpop.eup %2321  ;;  %v516_v3 = vmul.f32 0.015625, %v456_v54  ;;  %v515_v9 = vmul.f32 0.015625, %v454_v55 }
 0x193   :  { %v706_v19 = vmul.f32 %v2322_v62, %v610_v11 }
 0x194   :  { %v580_v13 = vsub.f32 %v516_v3, %v548_v63  ;;  %v579_v15 = vsub.f32 %v515_v9, %v547_v2 }
 0x195   :  { %v2892_v16 = vpop.xlane.xlu1 %487  ;;  %v2894_v17 = vpop.xlane.xlu0 %485  ;;  %v744_v14 = vmul.f32 %v2899_v29, %v706_v19 }
 0x196   :  { %v644_v20 = vadd.f32 1e-05, %v580_v13  ;;  %v643_v26 = vadd.f32 1e-05, %v579_v15 }
 0x197   :  { %v782_v51 = vadd.f32 %v2906_v35, %v744_v14 }
 0x198   :  { %2325 = vrsqrt.f32 %v644_v20 }
 0x199   :  { %2327 = vrsqrt.f32 %v643_v26  ;;  %v332_v31 = vpop.xlane.xlu1 %331  ;;  %v330_v48 = vpop.xlane.xlu0 %329  ;;  %v814_v11 = vmax.f32 %v782_v51, 0.0 }
 0x19a   :  { %v2324_v34 = vpop.eup %2323  ;;  %v390_v27 = vmul.f32 0.015625, %v332_v31  ;;  %v389_v62 = vmul.f32 0.015625, %v330_v48  ;;  %v611_v31 = vsub.f32 %v2693_v57, %v387_v50 }
 0x19b   :  { %v705_v38 = vmul.f32 %v2324_v34, %v609_v30 }
 0x19c   :  { %v550_v13 = vmul.f32 %v390_v27, %v390_v27  ;;  %v549_v15 = vmul.f32 %v389_v62, %v389_v62 }
 0x19d   :  { %v2908_v39 = vpop.xlane.xlu1 %363  ;;  %v2910_v54 = vpop.xlane.xlu0 %361  ;;  %v743_v55 = vmul.f32 %v2899_v29, %v705_v38  ;;  %v612_v38 = vsub.f32 %v2691_v56, %v388_v47 }
 0x19f   :  { %v781_v63 = vadd.f32 %v2906_v35, %v743_v55 }
 0x1a1   :  { %v460_v2 = vpop.xlane.xlu1 %459  ;;  %v458_v3 = vpop.xlane.xlu0 %457  ;;  %v813_v9 = vmax.f32 %v781_v63, 0.0 }
 0x1a2   :  { %v518_v19 = vmul.f32 0.015625, %v460_v2  ;;  %v517_v20 = vmul.f32 0.015625, %v458_v3 }
 0x1a3   :  { %2158 = vmatprep.mubr.f32.mxu1 %v813_v9 }
 0x1a4   :  { %v582_v26 = vsub.f32 %v518_v19, %v550_v13  ;;  %v581_v30 = vsub.f32 %v517_v20, %v549_v15  ;;  %2159 = vmatmul.mubr.f32.vlgmr.msra.gmra.mxu1 %v814_v11 }
 0x1a5   :  { %v2326_v34 = vpop.eup %2325  ;;  %v2917_v48 = vpop.xlane.xlu1 %491 }
 0x1a6   :  { %v2919_v14 = vpop.xlane.xlu0 %489  ;;  %v2328_v55 = vpop.eup %2327  ;;  %v646_v63 = vadd.f32 1e-05, %v582_v26  ;;  %v645_v51 = vadd.f32 1e-05, %v581_v30  ;;  %v708_v5 = vmul.f32 %v2326_v34, %v612_v38 }
 0x1a7   :  { %v707_v6 = vmul.f32 %v2328_v55, %v611_v31 }
 0x1a8   :  { %2329 = vrsqrt.f32 %v646_v63  ;;  %v746_v11 = vmul.f32 %v2899_v29, %v708_v5 }
 0x1a9   :  { %2331 = vrsqrt.f32 %v645_v51  ;;  %v336_v2 = vpop.xlane.xlu1 %335  ;;  %v745_v9 = vmul.f32 %v2899_v29, %v707_v6  ;;  %v614_v51 = vsub.f32 %v2723_v4, %v390_v27 }
 0x1aa   :  { %v334_v3 = vpop.xlane.xlu0 %333  ;;  %v784_v57 = vadd.f32 %v2906_v35, %v746_v11  ;;  %v2929_v19 = vmul.f32 0.015625, %v336_v2  ;;  %v613_v2 = vsub.f32 %v2731_v7, %v389_v62 }
 0x1ab   :  { %v783_v56 = vadd.f32 %v2906_v35, %v745_v9  ;;  %v2931_v20 = vmul.f32 0.015625, %v334_v3 }
 0x1ac   :  { %v816_v15 = vmax.f32 %v784_v57, 0.0  ;;  %v552_v5 = vmul.f32 %v2929_v19, %v2929_v19 }
 0x1ad   :  { %v2925_v47 = vpop.xlane.xlu1 %367  ;;  %v815_v13 = vmax.f32 %v783_v56, 0.0  ;;  %v551_v30 = vmul.f32 %v2931_v20, %v2931_v20 }
 0x1ae   :  { %v2927_v50 = vpop.xlane.xlu0 %365 }
 0x1af   :  { %2161 = vmatprep.mubr.f32.mxu1 %v815_v13 }
 0x1b0   :  { %2162 = vmatmul.mubr.f32.gmra.mxu1 %v816_v15 }
 0x1b1   :  { %v464_v26 = vpop.xlane.xlu1 %463 }
 0x1b2   :  { %v462_v6 = vpop.xlane.xlu0 %461  ;;  %v520_v34 = vmul.f32 0.015625, %v464_v26  ;;  %v2944_v26 = vmul.f32 0.015625, %v2879_v12 }
 0x1b3   :  { %v519_v38 = vmul.f32 0.015625, %v462_v6 }
 0x1b4   :  { %v584_v31 = vsub.f32 %v520_v34, %v552_v5  ;;  %v562_v12 = vmul.f32 %v2944_v26, %v2944_v26 }
 0x1b5   :  { %v583_v55 = vsub.f32 %v519_v38, %v551_v30  ;;  %v2330_v63 = vpop.eup %2329  ;;  %v2939_v3 = vpop.xlane.xlu1 %495  ;;  %v530_v30 = vmul.f32 0.015625, %v2881_v23 }
 0x1b6   :  { %v2941_v9 = vpop.xlane.xlu0 %493  ;;  %v2332_v11 = vpop.eup %2331  ;;  %v648_v56 = vadd.f32 1e-05, %v584_v31  ;;  %v710_v15 = vmul.f32 %v2330_v63, %v614_v51  ;;  %v2958_v31 = vmul.f32 0.015625, %v2883_v25 }
 0x1b7   :  { %v647_v57 = vadd.f32 1e-05, %v583_v55  ;;  %v709_v13 = vmul.f32 %v2332_v11, %v613_v2 }
 0x1b8   :  { %2333 = vrsqrt.f32 %v648_v56  ;;  %v748_v7 = vmul.f32 %v2899_v29, %v710_v15  ;;  %v529_v15 = vmul.f32 0.015625, %v2885_v28 }
 0x1b9   :  { %2335 = vrsqrt.f32 %v647_v57  ;;  %v340_v6 = vpop.xlane.xlu1 %339  ;;  %v747_v4 = vmul.f32 %v2899_v29, %v709_v13  ;;  %v594_v13 = vsub.f32 %v530_v30, %v562_v12 }
 0x1ba   :  { %v338_v5 = vpop.xlane.xlu0 %337  ;;  %v2948_v27 = vmul.f32 0.015625, %v340_v6  ;;  %v786_v38 = vadd.f32 %v2906_v35, %v748_v7  ;;  %v2966_v6 = vmul.f32 0.015625, %v2887_v42  ;;  %v2971_v7 = vmul.f32 0.015625, %v2889_v43 }
 0x1bb   :  { %v2950_v62 = vmul.f32 0.015625, %v338_v5  ;;  %v785_v34 = vadd.f32 %v2906_v35, %v747_v4  ;;  %v561_v4 = vmul.f32 %v2958_v31, %v2958_v31  ;;  %v658_v12 = vadd.f32 1e-05, %v594_v13 }
 0x1bc   :  { %v818_v2 = vmax.f32 %v786_v38, 0.0  ;;  %v554_v11 = vmul.f32 %v2948_v27, %v2948_v27  ;;  %v616_v43 = vsub.f32 %v2761_v18, %v2929_v19 }
 0x1bd   :  { %v468_v55 = vpop.xlane.xlu1 %467  ;;  %v817_v51 = vmax.f32 %v785_v34, 0.0  ;;  %v553_v23 = vmul.f32 %v2950_v62, %v2950_v62  ;;  %v593_v42 = vsub.f32 %v529_v15, %v561_v4 }
 0x1be   :  { %v466_v63 = vpop.xlane.xlu0 %465  ;;  %v522_v56 = vmul.f32 0.015625, %v468_v55 }
 0x1bf   :  { %v521_v57 = vmul.f32 0.015625, %v466_v63  ;;  %2164 = vmatprep.mubr.f32.mxu1 %v817_v51  ;;  %v532_v51 = vmul.f32 0.015625, %v2892_v16  ;;  %v657_v4 = vadd.f32 1e-05, %v593_v42 }
 0x1c0   :  { %v586_v25 = vsub.f32 %v522_v56, %v554_v11  ;;  %2165 = vmatmul.mubr.f32.gmra.mxu1 %v818_v2  ;;  %v564_v2 = vmul.f32 %v2966_v6, %v2966_v6  ;;  %v531_v11 = vmul.f32 0.015625, %v2894_v17  ;;  %v563_v56 = vmul.f32 %v2971_v7, %v2971_v7 }
 0x1c1   :  { %v585_v5 = vsub.f32 %v521_v57, %v553_v23  ;;  %v344_v34 = vpop.xlane.xlu1 %343  ;;  %v615_v57 = vsub.f32 %v2769_v21, %v2931_v20 }
 0x1c2   :  { %v342_v38 = vpop.xlane.xlu0 %341  ;;  %v650_v55 = vadd.f32 1e-05, %v586_v25  ;;  %v2973_v30 = vmul.f32 0.015625, %v344_v34  ;;  %v596_v34 = vsub.f32 %v532_v51, %v564_v2 }
 0x1c3   :  { %v649_v63 = vadd.f32 1e-05, %v585_v5  ;;  %v2975_v28 = vmul.f32 0.015625, %v342_v38 }
 0x1c4   :  { %2337 = vrsqrt.f32 %v650_v55  ;;  %v556_v16 = vmul.f32 %v2973_v30, %v2973_v30  ;;  %v595_v55 = vsub.f32 %v531_v11, %v563_v56  ;;  %v660_v42 = vadd.f32 1e-05, %v596_v34 }
 0x1c5   :  { %v2334_v23 = vpop.eup %2333  ;;  %2339 = vrsqrt.f32 %v649_v63  ;;  %v472_v13 = vpop.xlane.xlu1 %471  ;;  %v555_v17 = vmul.f32 %v2975_v28, %v2975_v28 }
 0x1c6   :  { %v470_v15 = vpop.xlane.xlu0 %469  ;;  %v2336_v25 = vpop.eup %2335  ;;  %v524_v5 = vmul.f32 0.015625, %v472_v13  ;;  %v712_v19 = vmul.f32 %v2334_v23, %v616_v43  ;;  %2341 = vrsqrt.f32 %v658_v12  ;;  %v659_v11 = vadd.f32 1e-05, %v595_v55 }
 0x1c7   :  { %v523_v18 = vmul.f32 0.015625, %v470_v15  ;;  %v711_v38 = vmul.f32 %v2336_v25, %v615_v57  ;;  %2343 = vrsqrt.f32 %v657_v4  ;;  %v3000_v12 = vmul.f32 0.015625, %v2910_v54 }
 0x1c8   :  { %v588_v1 = vsub.f32 %v524_v5, %v556_v16  ;;  %v750_v21 = vmul.f32 %v2899_v29, %v712_v19  ;;  %v3007_v15 = vmul.f32 0.015625, %v2908_v39  ;;  %v534_v5 = vmul.f32 0.015625, %v2917_v48 }
 0x1c9   :  { %v587_v0 = vsub.f32 %v523_v18, %v555_v17  ;;  %v348_v20 = vpop.xlane.xlu1 %347  ;;  %v749_v59 = vmul.f32 %v2899_v29, %v711_v38  ;;  %v565_v17 = vmul.f32 %v3000_v12, %v3000_v12  ;;  %v618_v18 = vsub.f32 %v2799_v32, %v2948_v27 }
 0x1ca   :  { %v346_v63 = vpop.xlane.xlu0 %345  ;;  %v652_v61 = vadd.f32 1e-05, %v588_v1  ;;  %v2993_v52 = vmul.f32 0.015625, %v348_v20  ;;  %v788_v2 = vadd.f32 %v2906_v35, %v750_v21  ;;  %v617_v39 = vsub.f32 %v2801_v33, %v2950_v62 }
 0x1cb   :  { %v651_v46 = vadd.f32 1e-05, %v587_v0  ;;  %v2995_v13 = vmul.f32 0.015625, %v346_v63  ;;  %v787_v51 = vadd.f32 %v2906_v35, %v749_v59  ;;  %v566_v20 = vmul.f32 %v3007_v15, %v3007_v15 }
 0x1cc   :  { %2345 = vrsqrt.f32 %v652_v61  ;;  %v820_v0 = vmax.f32 %v788_v2, 0.0  ;;  %v558_v56 = vmul.f32 %v2993_v52, %v2993_v52  ;;  %v533_v61 = vmul.f32 0.015625, %v2919_v14 }
 0x1cd   :  { %2347 = vrsqrt.f32 %v651_v46  ;;  %v476_v43 = vpop.xlane.xlu1 %475  ;;  %v819_v1 = vmax.f32 %v787_v51, 0.0  ;;  %v557_v57 = vmul.f32 %v2995_v13, %v2995_v13  ;;  %v3024_v32 = vmul.f32 0.015625, %v2927_v50 }
 0x1ce   :  { %v474_v23 = vpop.xlane.xlu0 %473  ;;  %v526_v16 = vmul.f32 0.015625, %v476_v43  ;;  %2349 = vrsqrt.f32 %v660_v42  ;;  %v597_v63 = vsub.f32 %v533_v61, %v565_v17  ;;  %v598_v33 = vsub.f32 %v534_v5, %v566_v20 }
 0x1cf   :  { %v525_v59 = vmul.f32 0.015625, %v474_v23  ;;  %2167 = vmatprep.mubr.f32.mxu1 %v819_v1  ;;  %2351 = vrsqrt.f32 %v659_v11  ;;  %v3040_v61 = vmul.f32 0.015625, %v2925_v47  ;;  %v620_v5 = vsub.f32 %v2809_v36, %v2973_v30 }
 0x1d0   :  { %v590_v46 = vsub.f32 %v526_v16, %v558_v56  ;;  %2168 = vmatmul.mubr.f32.gmra.mxu1 %v820_v0  ;;  %v661_v0 = vadd.f32 1e-05, %v597_v63  ;;  %v535_v56 = vmul.f32 0.015625, %v2941_v9  ;;  %v619_v9 = vsub.f32 %v2811_v37, %v2975_v28 }
 0x1d1   :  { %v589_v54 = vsub.f32 %v525_v59, %v557_v57  ;;  %v2338_v25 = vpop.eup %2337  ;;  %v352_v19 = vpop.xlane.xlu1 %351  ;;  %v536_v47 = vmul.f32 0.015625, %v2939_v3  ;;  %v662_v37 = vadd.f32 1e-05, %v598_v33  ;;  %v568_v28 = vmul.f32 %v3040_v61, %v3040_v61 }
 0x1d2   :  { %v350_v4 = vpop.xlane.xlu0 %349  ;;  %v2340_v14 = vpop.eup %2339  ;;  %v654_v34 = vadd.f32 1e-05, %v590_v46  ;;  %v3017_v55 = vmul.f32 0.015625, %v352_v19  ;;  %v714_v42 = vmul.f32 %v2338_v25, %v618_v18  ;;  %v567_v46 = vmul.f32 %v3024_v32, %v3024_v32 }
 0x1d3   :  { %v653_v38 = vadd.f32 1e-05, %v589_v54  ;;  %v3019_v21 = vmul.f32 0.015625, %v350_v4  ;;  %v713_v48 = vmul.f32 %v2340_v14, %v617_v39  ;;  %v3028_v11 = vpop.eup %2341 }
 0x1d4   :  { %2353 = vrsqrt.f32 %v654_v34  ;;  %v752_v2 = vmul.f32 %v2899_v29, %v714_v42  ;;  %v560_v43 = vmul.f32 %v3017_v55, %v3017_v55  ;;  %v3037_v59 = vpop.eup %2343  ;;  %v599_v63 = vsub.f32 %v535_v56, %v567_v46 }
 0x1d5   :  { %2355 = vrsqrt.f32 %v653_v38  ;;  %v480_v27 = vpop.xlane.xlu1 %479  ;;  %v751_v51 = vmul.f32 %v2899_v29, %v713_v48  ;;  %v559_v23 = vmul.f32 %v3019_v21, %v3019_v21  ;;  %v622_v46 = vsub.f32 %v2819_v40, %v2993_v52 }
 0x1d6   :  { %v478_v62 = vpop.xlane.xlu0 %477  ;;  %v528_v1 = vmul.f32 0.015625, %v480_v27  ;;  %v790_v16 = vadd.f32 %v2906_v35, %v752_v2  ;;  %v663_v56 = vadd.f32 1e-05, %v599_v63 }
 0x1d7   :  { %v527_v50 = vmul.f32 0.015625, %v478_v62  ;;  %v789_v57 = vadd.f32 %v2906_v35, %v751_v51 }
 0x1d8   :  { %v592_v54 = vsub.f32 %v528_v1, %v560_v43  ;;  %v822_v4 = vmax.f32 %v790_v16, 0.0 }
 0x1d9   :  { %v591_v25 = vsub.f32 %v527_v50, %v559_v23  ;;  %v2346_v17 = vpop.eup %2345  ;;  %v372_v18 = vpop.xlane.xlu1 %371  ;;  %v821_v19 = vmax.f32 %v789_v57, 0.0  ;;  %v600_v23 = vsub.f32 %v536_v47, %v568_v28 }
 0x1da   :  { %v370_v39 = vpop.xlane.xlu0 %369  ;;  %v2348_v14 = vpop.eup %2347  ;;  %v656_v34 = vadd.f32 1e-05, %v592_v54  ;;  %v3051_v48 = vmul.f32 0.015625, %v372_v18  ;;  %v716_v36 = vmul.f32 %v2346_v17, %v620_v5  ;;  %v621_v17 = vsub.f32 %v2821_v41, %v2995_v13 }
 0x1db   :  { %v655_v38 = vadd.f32 1e-05, %v591_v25  ;;  %v3049_v20 = vmul.f32 0.015625, %v370_v39  ;;  %2170 = vmatprep.mubr.f32.mxu1 %v821_v19  ;;  %v715_v42 = vmul.f32 %v2348_v14, %v619_v9  ;;  %v3053_v30 = vpop.eup %2349  ;;  %v664_v14 = vadd.f32 1e-05, %v600_v23 }
 0x1dc   :  { %2357 = vrsqrt.f32 %v656_v34  ;;  %2171 = vmatmul.mubr.f32.gmra.mxu1 %v822_v4  ;;  %v3059_v27 = vpop.eup %2351  ;;  %v570_v62 = vmul.f32 %v3051_v48, %v3051_v48  ;;  %v754_v33 = vmul.f32 %v2899_v29, %v716_v36  ;;  %v625_v4 = vsub.f32 %v2684_v53, %v2958_v31 }
 0x1dd   :  { %v569_v3 = vmul.f32 %v3049_v20, %v3049_v20  ;;  %2359 = vrsqrt.f32 %v655_v38  ;;  %v500_v51 = vpop.xlane.xlu1 %499  ;;  %v753_v43 = vmul.f32 %v2899_v29, %v715_v42  ;;  %v626_v41 = vsub.f32 %v2673_v49, %v2944_v26 }
 0x1de   :  { %v498_v2 = vpop.xlane.xlu0 %497  ;;  %v538_v1 = vmul.f32 0.015625, %v500_v51  ;;  %2361 = vrsqrt.f32 %v661_v0  ;;  %v792_v16 = vadd.f32 %v2906_v35, %v754_v33  ;;  %v721_v53 = vmul.f32 %v3037_v59, %v625_v4 }
 0x1df   :  { %v537_v50 = vmul.f32 0.015625, %v498_v2  ;;  %v791_v57 = vadd.f32 %v2906_v35, %v753_v43  ;;  %2363 = vrsqrt.f32 %v662_v37  ;;  %v628_v31 = vsub.f32 %v2695_v58, %v2966_v6 }
 0x1e0   :  { %v602_v5 = vsub.f32 %v538_v1, %v570_v62  ;;  %v824_v19 = vmax.f32 %v792_v16, 0.0  ;;  %2365 = vrsqrt.f32 %v663_v56  ;;  %v627_v49 = vsub.f32 %v2702_v60, %v2971_v7 }
 0x1e1   :  { %v601_v54 = vsub.f32 %v537_v50, %v569_v3  ;;  %v2354_v25 = vpop.eup %2353  ;;  %v376_v9 = vpop.xlane.xlu1 %375  ;;  %v823_v39 = vmax.f32 %v791_v57, 0.0  ;;  %2367 = vrsqrt.f32 %v664_v14  ;;  %v722_v58 = vmul.f32 %v3028_v11, %v626_v41 }
 0x1e2   :  { %v374_v18 = vpop.xlane.xlu0 %373  ;;  %v2356_v0 = vpop.eup %2355  ;;  %v3073_v47 = vmul.f32 0.015625, %v376_v9  ;;  %v718_v38 = vmul.f32 %v2354_v25, %v622_v46  ;;  %v666_v42 = vadd.f32 1e-05, %v602_v5  ;;  %v624_v6 = vsub.f32 %v2829_v44, %v3017_v55 }
 0x1e3   :  { %v3075_v34 = vmul.f32 0.015625, %v374_v18  ;;  %v665_v40 = vadd.f32 1e-05, %v601_v54  ;;  %2173 = vmatprep.mubr.f32.mxu1 %v823_v39  ;;  %v717_v52 = vmul.f32 %v2356_v0, %v621_v17  ;;  %v759_v33 = vmul.f32 %v2899_v29, %v721_v53 }
 0x1e4   :  { %v572_v13 = vmul.f32 %v3073_v47, %v3073_v47  ;;  %2174 = vmatmul.mubr.f32.gmra.mxu1 %v824_v19  ;;  %v756_v3 = vmul.f32 %v2899_v29, %v718_v38  ;;  %v623_v60 = vsub.f32 %v2831_v45, %v3019_v21  ;;  %v760_v25 = vmul.f32 %v2899_v29, %v722_v58 }
 0x1e5   :  { %v571_v63 = vmul.f32 %v3075_v34, %v3075_v34  ;;  %v504_v36 = vpop.xlane.xlu1 %503  ;;  %v755_v28 = vmul.f32 %v2899_v29, %v717_v52  ;;  %2369 = vrsqrt.f32 %v665_v40  ;;  %v723_v17 = vmul.f32 %v3059_v27, %v627_v49 }
 0x1e6   :  { %v502_v37 = vpop.xlane.xlu0 %501  ;;  %v540_v26 = vmul.f32 0.015625, %v504_v36  ;;  %v794_v59 = vadd.f32 %v2906_v35, %v756_v3  ;;  %2371 = vrsqrt.f32 %v666_v42  ;;  %v797_v9 = vadd.f32 %v2906_v35, %v759_v33 }
 0x1e7   :  { %v539_v62 = vmul.f32 0.015625, %v502_v37  ;;  %v793_v51 = vadd.f32 %v2906_v35, %v755_v28  ;;  %v724_v18 = vmul.f32 %v3053_v30, %v628_v31  ;;  %v629_v19 = vsub.f32 %v2740_v10, %v3000_v12 }
 0x1e8   :  { %v604_v2 = vsub.f32 %v540_v26, %v572_v13  ;;  %v826_v56 = vmax.f32 %v794_v59, 0.0  ;;  %v630_v40 = vsub.f32 %v2733_v8, %v3007_v15  ;;  %v761_v13 = vmul.f32 %v2899_v29, %v723_v17 }
 0x1e9   :  { %v603_v43 = vsub.f32 %v539_v62, %v571_v63  ;;  %v2358_v23 = vpop.eup %2357  ;;  %v380_v7 = vpop.xlane.xlu1 %379  ;;  %v825_v50 = vmax.f32 %v793_v51, 0.0  ;;  %v798_v31 = vadd.f32 %v2906_v35, %v760_v25  ;;  %v762_v42 = vmul.f32 %v2899_v29, %v724_v18  ;;  %v3717_v18 = vld [vmem:[#allocation8_spill] sm:$0xff] }
 0x1ea   :  { %v378_v1 = vpop.xlane.xlu0 %377  ;;  %v2360_v57 = vpop.eup %2359  ;;  %v668_v16 = vadd.f32 1e-05, %v604_v2  ;;  %v3098_v11 = vmul.f32 0.015625, %v380_v7  ;;  %v720_v55 = vmul.f32 %v2358_v23, %v624_v6  ;;  %v631_v8 = vsub.f32 %v2778_v24, %v3024_v32 }
 0x1eb   :  { %v667_v46 = vadd.f32 1e-05, %v603_v43  ;;  %v3100_v54 = vmul.f32 0.015625, %v378_v1  ;;  %2176 = vmatprep.mubr.f32.mxu1 %v825_v50  ;;  %v719_v44 = vmul.f32 %v2360_v57, %v623_v60  ;;  %v2362_v45 = vpop.eup %2361  ;;  %v829_v58 = vmax.f32 %v797_v9, 0.0  ;;  %v3715_v60 = vld [vmem:[#allocation6_spill] sm:$0xff] }
 0x1ec   :  { %v574_v21 = vmul.f32 %v3098_v11, %v3098_v11  ;;  %2177 = vmatmul.mubr.f32.gmra.mxu1 %v826_v56  ;;  %v2364_v39 = vpop.eup %2363  ;;  %v758_v14 = vmul.f32 %v2899_v29, %v720_v55  ;;  %v725_v10 = vmul.f32 %v2362_v45, %v629_v19  ;;  %v799_v6 = vadd.f32 %v2906_v35, %v761_v13 }
 0x1ed   :  { %v573_v5 = vmul.f32 %v3100_v54, %v3100_v54  ;;  %2373 = vrsqrt.f32 %v667_v46  ;;  %v508_v0 = vpop.xlane.xlu1 %507  ;;  %v757_v27 = vmul.f32 %v2899_v29, %v719_v44  ;;  %v2366_v12 = vpop.eup %2365  ;;  %v726_v3 = vmul.f32 %v2364_v39, %v630_v40 }
 0x1ee   :  { %v506_v4 = vpop.xlane.xlu0 %505  ;;  %2375 = vrsqrt.f32 %v668_v16  ;;  %v542_v52 = vmul.f32 0.015625, %v508_v0  ;;  %v796_v30 = vadd.f32 %v2906_v35, %v758_v14  ;;  %v2368_v59 = vpop.eup %2367  ;;  %v763_v2 = vmul.f32 %v2899_v29, %v725_v10  ;;  %v3718_v10 = vld [vmem:[#allocation7_spill] sm:$0xff] }
 0x1ef   :  { %v541_v38 = vmul.f32 0.015625, %v506_v4  ;;  %v795_v41 = vadd.f32 %v2906_v35, %v757_v27  ;;  %v727_v43 = vmul.f32 %v2366_v12, %v631_v8  ;;  %v632_v32 = vsub.f32 %v2771_v22, %v3040_v61 }
 0x1f0   :  { %v606_v63 = vsub.f32 %v542_v52, %v574_v21  ;;  %v828_v28 = vmax.f32 %v796_v30, 0.0  ;;  %v633_v7 = vsub.f32 %v3715_v60, %v3049_v20  ;;  %v800_v56 = vadd.f32 %v2906_v35, %v762_v42  ;;  %v3716_v20 = vld [vmem:[#allocation5_spill] sm:$0xff] }
 0x1f1   :  { %v605_v53 = vsub.f32 %v541_v38, %v573_v5  ;;  %v384_v15 = vpop.xlane.xlu1 %383  ;;  %v827_v37 = vmax.f32 %v795_v41, 0.0  ;;  %v764_v57 = vmul.f32 %v2899_v29, %v726_v3  ;;  %v830_v46 = vmax.f32 %v798_v31, 0.0 }
 0x1f2   :  { %v382_v36 = vpop.xlane.xlu0 %381  ;;  %v670_v49 = vadd.f32 1e-05, %v606_v63  ;;  %v3123_v62 = vmul.f32 0.015625, %v384_v15  ;;  %v2370_v24 = vpop.eup %2369  ;;  %v728_v44 = vmul.f32 %v2368_v59, %v632_v32  ;;  %v831_v55 = vmax.f32 %v799_v6, 0.0 }
 0x1f3   :  { %v669_v26 = vadd.f32 1e-05, %v605_v53  ;;  %v3125_v51 = vmul.f32 0.015625, %v382_v36  ;;  %2179 = vmatprep.mubr.f32.mxu1 %v827_v37  ;;  %v2372_v22 = vpop.eup %2371  ;;  %v801_v25 = vadd.f32 %v2906_v35, %v763_v2  ;;  %v765_v17 = vmul.f32 %v2899_v29, %v727_v43  ;;  %v3719_v36 = vld [vmem:[#allocation9_spill] sm:$0xff] }
 0x1f4   :  { %2377 = vrsqrt.f32 %v670_v49  ;;  %v576_v33 = vmul.f32 %v3123_v62, %v3123_v62  ;;  %2180 = vmatmul.mubr.f32.gmra.mxu1 %v828_v28  ;;  %v729_v45 = vmul.f32 %v2370_v24, %v633_v7  ;;  %v634_v21 = vsub.f32 %v3716_v20, %v3051_v48  ;;  %v3720_v28 = vld [vmem:[#allocation10_spill] sm:$0xff]  ;;  %v3721_v7 = vld [vmem:[#allocation11_spill] sm:$0xff] }
 0x1f5   :  { %v575_v23 = vmul.f32 %v3125_v51, %v3125_v51  ;;  %2379 = vrsqrt.f32 %v669_v26  ;;  %2182 = vmatprep.mubr.f32.mxu1 %v829_v58  ;;  %v512_v1 = vpop.xlane.xlu1 %511  ;;  %v635_v39 = vsub.f32 %v3717_v18, %v3075_v34  ;;  %v832_v19 = vmax.f32 %v800_v56, 0.0  ;;  %v3722_v56 = vld [vmem:[#allocation12_spill] sm:$0xff] }
 0x1f6   :  { %v510_v50 = vpop.xlane.xlu0 %509  ;;  %v544_v61 = vmul.f32 0.015625, %v512_v1  ;;  %v802_v0 = vadd.f32 %v2906_v35, %v764_v57  ;;  %v766_v40 = vmul.f32 %v2899_v29, %v728_v44  ;;  %v730_v52 = vmul.f32 %v2372_v22, %v634_v21 }
 0x1f7   :  { %v543_v16 = vmul.f32 0.015625, %v510_v50  ;;  %v833_v41 = vmax.f32 %v801_v25, 0.0  ;;  %v803_v48 = vadd.f32 %v2906_v35, %v765_v17  ;;  %v767_v30 = vmul.f32 %v2899_v29, %v729_v45 }
 0x1f8   :  { %v608_v5 = vsub.f32 %v544_v61, %v576_v33  ;;  %2183 = vmatmul.mubr.f32.gmra.mxu1 %v830_v46  ;;  %v636_v34 = vsub.f32 %v3718_v10, %v3073_v47  ;;  %v834_v12 = vmax.f32 %v802_v0, 0.0  ;;  %v804_v63 = vadd.f32 %v2906_v35, %v766_v40  ;;  %v1627_v0 = vld [vmem:[#allocation2 + $0x78] sm:$0xff]  ;;  %v1624_v40 = vld [vmem:[#allocation2 + $0x60] sm:$0xff] }
 0x1f9   :  { %v607_v9 = vsub.f32 %v543_v16, %v575_v23  ;;  %2185 = vmatprep.mubr.f32.mxu1 %v831_v55  ;;  %v768_v53 = vmul.f32 %v2899_v29, %v730_v52  ;;  %v835_v42 = vmax.f32 %v803_v48, 0.0  ;;  %v805_v8 = vadd.f32 %v2906_v35, %v767_v30  ;;  %2206 = vmatprep.subr.mxu0 %v1627_v0  ;;  %v1623_v52 = vld [vmem:[#allocation2 + $0x58] sm:$0xff]  ;;  %v1620_v30 = vld [vmem:[#allocation2 + $0x40] sm:$0xff] }
 0x1fa   :  { %v2374_v4 = vpop.eup %2373  ;;  %v672_v27 = vadd.f32 1e-05, %v608_v5  ;;  %v638_v37 = vsub.f32 %v3719_v36, %v3098_v11  ;;  %v637_v3 = vsub.f32 %v3720_v28, %v3100_v54  ;;  %v836_v26 = vmax.f32 %v804_v63, 0.0  ;;  %2207 = vmatpush3.msra.mxu0 %v1627_v0  ;;  %v1618_v63 = vld [vmem:[#allocation2 + $0x30] sm:$0xff] }
 0x1fb   :  { %v671_v14 = vadd.f32 1e-05, %v607_v9  ;;  %v2376_v38 = vpop.eup %2375  ;;  %v731_v13 = vmul.f32 %v2374_v4, %v635_v39  ;;  %v806_v59 = vadd.f32 %v2906_v35, %v768_v53  ;;  %v837_v2 = vmax.f32 %v805_v8, 0.0  ;;  %v1617_v53 = vld [vmem:[#allocation2 + $0x28] sm:$0xff]  ;;  %v1614_v8 = vld [vmem:[#allocation2 + $0x10] sm:$0xff] }
 0x1fc   :  { %2381 = vrsqrt.f32 %v672_v27  ;;  %2186 = vmatmul.mubr.f32.gmra.mxu1 %v832_v19  ;;  %v732_v31 = vmul.f32 %v2376_v38, %v636_v34  ;;  %v640_v1 = vsub.f32 %v3721_v7, %v3123_v62  ;;  %v639_v57 = vsub.f32 %v3722_v56, %v3125_v51  ;;  %v1626_v27 = vld [vmem:[#allocation2 + $0x70] sm:$0xff]  ;;  %v1619_v34 = vld [vmem:[#allocation2 + $0x38] sm:$0xff] }
 0x1fd   :  { %2383 = vrsqrt.f32 %v671_v14  ;;  %2188 = vmatprep.mubr.f32.mxu1 %v833_v41  ;;  %v769_v15 = vmul.f32 %v2899_v29, %v731_v13  ;;  %v838_v32 = vmax.f32 %v806_v59, 0.0  ;;  %2208 = vmatprep.subr.mxu0 %v1626_v27  ;;  %v1625_v14 = vld [vmem:[#allocation2 + $0x68] sm:$0xff]  ;;  %v1622_v38 = vld [vmem:[#allocation2 + $0x50] sm:$0xff] }
 0x1fe   :  { %v770_v58 = vmul.f32 %v2899_v29, %v732_v31  ;;  %2209 = vmatpush3.msra.mxu0 %v1626_v27  ;;  %v1621_v41 = vld [vmem:[#allocation2 + $0x48] sm:$0xff]  ;;  %v1616_v31 = vld [vmem:[#allocation2 + $0x20] sm:$0xff] }
 0x1ff   :  { %v807_v43 = vadd.f32 %v2906_v35, %v769_v15  ;;  %2210 = vmatprep.subr.mxu0 %v1625_v14  ;;  %v1613_v15 = vld [vmem:[#allocation2 + $0x8] sm:$0xff] }
 0x200   :  { %2189 = vmatmul.mubr.f32.gmra.mxu1 %v834_v12  ;;  %v808_v33 = vadd.f32 %v2906_v35, %v770_v58  ;;  %2211 = vmatpush3.msra.mxu0 %v1625_v14 }
 0x201   :  { %v2378_v47 = vpop.eup %2377  ;;  %2191 = vmatprep.mubr.f32.mxu1 %v835_v42  ;;  %v839_v23 = vmax.f32 %v807_v43, 0.0  ;;  %2212 = vmatprep.subr.mxu0 %v1624_v40  ;;  %v1615_v42 = vld [vmem:[#allocation2 + $0x18] sm:$0xff] }
 0x202   :  { %v2380_v49 = vpop.eup %2379  ;;  %v734_v6 = vmul.f32 %v2378_v47, %v638_v37  ;;  %v840_v61 = vmax.f32 %v808_v33, 0.0  ;;  %2213 = vmatpush3.msra.mxu0 %v1624_v40  ;;  %v1612_v37 = vld [vmem:[#allocation2] sm:$0xff] }
 0x203   :  { %v733_v24 = vmul.f32 %v2380_v49, %v637_v3  ;;  %2214 = vmatprep.subr.mxu0 %v1623_v52 }
 0x204   :  { %2192 = vmatmul.mubr.f32.gmra.mxu1 %v836_v26  ;;  %v772_v54 = vmul.f32 %v2899_v29, %v734_v6  ;;  %2215 = vmatpush3.msra.mxu0 %v1623_v52 }
 0x205   :  { %2194 = vmatprep.mubr.f32.mxu1 %v837_v2  ;;  %v771_v11 = vmul.f32 %v2899_v29, %v733_v24  ;;  %2216 = vmatprep.subr.mxu0 %v1622_v38 }
 0x206   :  { %v810_v16 = vadd.f32 %v2906_v35, %v772_v54  ;;  %2217 = vmatpush3.msra.mxu0 %v1622_v38 }
 0x207   :  { %v809_v60 = vadd.f32 %v2906_v35, %v771_v11  ;;  %2218 = vmatprep.subr.mxu0 %v1621_v41 }
 0x208   :  { %2195 = vmatmul.mubr.f32.gmra.mxu1 %v838_v32  ;;  %v842_v62 = vmax.f32 %v810_v16, 0.0  ;;  %2219 = vmatpush3.msra.mxu0 %v1621_v41 }
 0x209   :  { %v2382_v50 = vpop.eup %2381  ;;  %2197 = vmatprep.mubr.f32.mxu1 %v839_v23  ;;  %v841_v44 = vmax.f32 %v809_v60, 0.0  ;;  %2220 = vmatprep.subr.mxu0 %v1620_v30 }
 0x20a   :  { %v2384_v22 = vpop.eup %2383  ;;  %v736_v46 = vmul.f32 %v2382_v50, %v640_v1  ;;  %2221 = vmatpush3.msra.mxu0 %v1620_v30 }
 0x20b   :  { %v735_v55 = vmul.f32 %v2384_v22, %v639_v57  ;;  %2222 = vmatprep.subr.mxu0 %v1619_v34 }
 0x20c   :  { %2198 = vmatmul.mubr.f32.gmra.mxu1 %v840_v61  ;;  %v774_v25 = vmul.f32 %v2899_v29, %v736_v46  ;;  %2223 = vmatpush3.msra.mxu0 %v1619_v34 }
 0x20d   :  { %2200 = vmatprep.mubr.f32.mxu1 %v841_v44  ;;  %v773_v17 = vmul.f32 %v2899_v29, %v735_v55  ;;  %2224 = vmatprep.subr.mxu0 %v1618_v63 }
 0x20e   :  { %v812_v45 = vadd.f32 %v2906_v35, %v774_v25  ;;  %2225 = vmatpush3.msra.mxu0 %v1618_v63 }
 0x20f   :  { %v811_v20 = vadd.f32 %v2906_v35, %v773_v17  ;;  %2226 = vmatprep.subr.mxu0 %v1617_v53 }
 0x210   :  { %2201 = vmatmul.mubr.f32.gmra.mxu1 %v842_v62  ;;  %v844_v51 = vmax.f32 %v812_v45, 0.0  ;;  %2227 = vmatpush3.msra.mxu0 %v1617_v53 }
 0x211   :  { %v843_v21 = vmax.f32 %v811_v20, 0.0  ;;  %2228 = vmatprep.subr.mxu0 %v1616_v31 }
 0x212   :  { %2229 = vmatpush3.msra.mxu0 %v1616_v31 }
 0x213   :  { %2203 = vmatprep.mubr.f32.mxu1 %v843_v21  ;;  %2230 = vmatprep.subr.mxu0 %v1615_v42 }
 0x214   :  { %2204 = vmatmul.mubr.f32.gmra.mxu1 %v844_v51  ;;  %2231 = vmatpush3.msra.mxu0 %v1615_v42 }
 0x215   :  { %2232 = vmatprep.subr.mxu0 %v1614_v8 }
 0x216   :  { %2233 = vmatpush3.msra.mxu0 %v1614_v8 }
 0x217   :  { %2234 = vmatprep.subr.mxu0 %v1613_v15 }
 0x218   :  { %2235 = vmatpush3.msra.mxu0 %v1613_v15 }
 0x219   :  { %2236 = vmatprep.subr.mxu0 %v1612_v37 }
 0x21a   :  { %2237 = vmatpush3.msra.mxu0 %v1612_v37 }
 0x264   :  { %v3175_v5 = vpop.f32.mrf.mxu1 }
 0x265   :  { %1090 = vadd.xlane.f32.xlu1 %v3175_v5  ;;  %v1185_v29 = vmul.f32 %v3175_v5, %v3175_v5 }
 0x266   :  { %v3178_v9 = vpop.f32.mrf.mxu1 }
 0x267   :  { %1088 = vadd.xlane.f32.xlu0 %v3178_v9  ;;  %v1184_v35 = vmul.f32 %v3178_v9, %v3178_v9 }
 0x269   :  { %1218 = vadd.xlane.f32.xlu1 %v1185_v29 }
 0x26b   :  { %1216 = vadd.xlane.f32.xlu0 %v1184_v35 }
 0x270   :  { %v3185_v18 = vpop.f32.mrf.mxu1 }
 0x271   :  { %1094 = vadd.xlane.f32.xlu1 %v3185_v18  ;;  %v1187_v19 = vmul.f32 %v3185_v18, %v3185_v18 }
 0x272   :  { %v3188_v39 = vpop.f32.mrf.mxu1 }
 0x273   :  { %1092 = vadd.xlane.f32.xlu0 %v3188_v39  ;;  %v1186_v4 = vmul.f32 %v3188_v39, %v3188_v39 }
 0x275   :  { %1222 = vadd.xlane.f32.xlu1 %v1187_v19 }
 0x277   :  { %1220 = vadd.xlane.f32.xlu0 %v1186_v4 }
 0x280   :  { %v3195_v48 = vpop.f32.mrf.mxu1 }
 0x281   :  { %1098 = vadd.xlane.f32.xlu1 %v3195_v48  ;;  %v1189_v10 = vmul.f32 %v3195_v48, %v3195_v48 }
 0x282   :  { %v3198_v13 = vpop.f32.mrf.mxu1 }
 0x283   :  { %1096 = vadd.xlane.f32.xlu0 %v3198_v13  ;;  %v1188_v12 = vmul.f32 %v3198_v13, %v3198_v13 }
 0x285   :  { %1226 = vadd.xlane.f32.xlu1 %v1189_v10 }
 0x287   :  { %1224 = vadd.xlane.f32.xlu0 %v1188_v12 }
 0x290   :  { %v3205_v36 = vpop.f32.mrf.mxu1 }
 0x291   :  { %1102 = vadd.xlane.f32.xlu1 %v3205_v36  ;;  %v1191_v28 = vmul.f32 %v3205_v36, %v3205_v36 }
 0x292   :  { %v3208_v47 = vpop.f32.mrf.mxu1 }
 0x293   :  { %1100 = vadd.xlane.f32.xlu0 %v3208_v47  ;;  %v1190_v3 = vmul.f32 %v3208_v47, %v3208_v47 }
 0x295   :  { %1230 = vadd.xlane.f32.xlu1 %v1191_v28 }
 0x297   :  { %1228 = vadd.xlane.f32.xlu0 %v1190_v3 }
 0x29c   :  { %v3215_v49 = vpop.f32.mrf.mxu1 }
 0x29d   :  { %1106 = vadd.xlane.f32.xlu1 %v3215_v49  ;;  %v1193_v59 = vmul.f32 %v3215_v49, %v3215_v49 }
 0x29e   :  { %v3218_v26 = vpop.f32.mrf.mxu1 }
 0x29f   :  { %1104 = vadd.xlane.f32.xlu0 %v3218_v26  ;;  %v1192_v58 = vmul.f32 %v3218_v26, %v3218_v26 }
 0x2a1   :  { %1234 = vadd.xlane.f32.xlu1 %v1193_v59 }
 0x2a3   :  { %1232 = vadd.xlane.f32.xlu0 %v1192_v58 }
 0x2a4   :  { %v3225_v6 = vpop.f32.mrf.mxu1 }
 0x2a5   :  { %1110 = vadd.xlane.f32.xlu1 %v3225_v6  ;;  %v1195_v43 = vmul.f32 %v3225_v6, %v3225_v6 }
 0x2a6   :  { %v3228_v2 = vpop.f32.mrf.mxu1 }
 0x2a7   :  { %1108 = vadd.xlane.f32.xlu0 %v3228_v2  ;;  %v1194_v24 = vmul.f32 %v3228_v2, %v3228_v2 }
 0x2a9   :  { %1238 = vadd.xlane.f32.xlu1 %v1195_v43 }
 0x2ab   :  { %1236 = vadd.xlane.f32.xlu0 %v1194_v24 }
 0x2ac   :  { %v3235_v11 = vpop.f32.mrf.mxu1 }
 0x2ad   :  { %1114 = vadd.xlane.f32.xlu1 %v3235_v11  ;;  %v1197_v33 = vmul.f32 %v3235_v11, %v3235_v11 }
 0x2ae   :  { %v3238_v32 = vpop.f32.mrf.mxu1 }
 0x2af   :  { %1112 = vadd.xlane.f32.xlu0 %v3238_v32  ;;  %v1196_v54 = vmul.f32 %v3238_v32, %v3238_v32 }
 0x2b1   :  { %1242 = vadd.xlane.f32.xlu1 %v1197_v33 }
 0x2b3   :  { %1240 = vadd.xlane.f32.xlu0 %v1196_v54 }
 0x2b4   :  { %v3245_v23 = vpop.f32.mrf.mxu1 }
 0x2b5   :  { %1118 = vadd.xlane.f32.xlu1 %v3245_v23  ;;  %v1199_v7 = vmul.f32 %v3245_v23, %v3245_v23 }
 0x2b6   :  { %v3248_v60 = vpop.f32.mrf.mxu1 }
 0x2b7   :  { %1116 = vadd.xlane.f32.xlu0 %v3248_v60  ;;  %v1198_v1 = vmul.f32 %v3248_v60, %v3248_v60 }
 0x2b8   :  { %v3255_v50 = vpop.f32.mrf.mxu1 }
 0x2b9   :  { %1246 = vadd.xlane.f32.xlu1 %v1199_v7  ;;  %v1201_v57 = vmul.f32 %v3255_v50, %v3255_v50 }
 0x2ba   :  { %v3258_v56 = vpop.f32.mrf.mxu1 }
 0x2bb   :  { %1244 = vadd.xlane.f32.xlu0 %v1198_v1  ;;  %v1200_v22 = vmul.f32 %v3258_v56, %v3258_v56 }
 0x2bc   :  { %v3265_v61 = vpop.f32.mrf.mxu1 }
 0x2bd   :  { %1122 = vadd.xlane.f32.xlu1 %v3255_v50  ;;  %v1203_v46 = vmul.f32 %v3265_v61, %v3265_v61 }
 0x2be   :  { %v3268_v16 = vpop.f32.mrf.mxu1 }
 0x2bf   :  { %1120 = vadd.xlane.f32.xlu0 %v3258_v56  ;;  %v1202_v44 = vmul.f32 %v3268_v16, %v3268_v16 }
 0x2c0   :  { %v3275_v55 = vpop.f32.mrf.mxu1 }
 0x2c1   :  { %1250 = vadd.xlane.f32.xlu1 %v1201_v57  ;;  %v1205_v17 = vmul.f32 %v3275_v55, %v3275_v55 }
 0x2c2   :  { %v3278_v25 = vpop.f32.mrf.mxu1 }
 0x2c3   :  { %1248 = vadd.xlane.f32.xlu0 %v1200_v22  ;;  %v1204_v62 = vmul.f32 %v3278_v25, %v3278_v25 }
 0x2c4   :  { %v3285_v45 = vpop.f32.mrf.mxu1 }
 0x2c5   :  { %1126 = vadd.xlane.f32.xlu1 %v3265_v61  ;;  %v1207_v51 = vmul.f32 %v3285_v45, %v3285_v45 }
 0x2c6   :  { %v3288_v20 = vpop.f32.mrf.mxu1 }
 0x2c7   :  { %1124 = vadd.xlane.f32.xlu0 %v3268_v16  ;;  %v1206_v21 = vmul.f32 %v3288_v20, %v3288_v20 }
 0x2c8   :  { %v3295_v29 = vpop.f32.mrf.mxu1 }
 0x2c9   :  { %1254 = vadd.xlane.f32.xlu1 %v1203_v46  ;;  %v1209_v19 = vmul.f32 %v3295_v29, %v3295_v29 }
 0x2ca   :  { %v3298_v35 = vpop.f32.mrf.mxu1 }
 0x2cb   :  { %1252 = vadd.xlane.f32.xlu0 %v1202_v44  ;;  %v1208_v0 = vmul.f32 %v3298_v35, %v3298_v35 }
 0x2cc   :  { %v3305_v4 = vpop.f32.mrf.mxu1 }
 0x2cd   :  { %1130 = vadd.xlane.f32.xlu1 %v3275_v55  ;;  %v1211_v14 = vmul.f32 %v3305_v4, %v3305_v4 }
 0x2ce   :  { %v3308_v27 = vpop.f32.mrf.mxu1 }
 0x2cf   :  { %1128 = vadd.xlane.f32.xlu0 %v3278_v25  ;;  %v1210_v40 = vmul.f32 %v3308_v27, %v3308_v27 }
 0x2d0   :  { %v3315_v52 = vpop.f32.mrf.mxu1 }
 0x2d1   :  { %1258 = vadd.xlane.f32.xlu1 %v1205_v17  ;;  %v1213_v30 = vmul.f32 %v3315_v52, %v3315_v52 }
 0x2d2   :  { %v3318_v38 = vpop.f32.mrf.mxu1 }
 0x2d3   :  { %1256 = vadd.xlane.f32.xlu0 %v1204_v62  ;;  %v1212_v12 = vmul.f32 %v3318_v38, %v3318_v38 }
 0x2d4   :  { %v3325_v53 = vpop.f32.mrf.mxu1 }
 0x2d5   :  { %1134 = vadd.xlane.f32.xlu1 %v3285_v45  ;;  %v1215_v58 = vmul.f32 %v3325_v53, %v3325_v53 }
 0x2d6   :  { %v3328_v59 = vpop.f32.mrf.mxu1 }
 0x2d7   :  { %1132 = vadd.xlane.f32.xlu0 %v3288_v20  ;;  %v1214_v33 = vmul.f32 %v3328_v59, %v3328_v59 }
 0x2d9   :  { %1262 = vadd.xlane.f32.xlu1 %v1207_v51 }
 0x2db   :  { %1260 = vadd.xlane.f32.xlu0 %v1206_v21 }
 0x2dd   :  { %1138 = vadd.xlane.f32.xlu1 %v3295_v29 }
 0x2df   :  { %1136 = vadd.xlane.f32.xlu0 %v3298_v35 }
 0x2e1   :  { %1266 = vadd.xlane.f32.xlu1 %v1209_v19 }
 0x2e3   :  { %1264 = vadd.xlane.f32.xlu0 %v1208_v0 }
 0x2e5   :  { %1142 = vadd.xlane.f32.xlu1 %v3305_v4 }
 0x2e7   :  { %1140 = vadd.xlane.f32.xlu0 %v3308_v27 }
 0x2e9   :  { %1270 = vadd.xlane.f32.xlu1 %v1211_v14 }
 0x2eb   :  { %1268 = vadd.xlane.f32.xlu0 %v1210_v40 }
 0x2ed   :  { %1146 = vadd.xlane.f32.xlu1 %v3315_v52 }
 0x2ee   :  { %v1091_v41 = vpop.xlane.xlu1 %1090 }
 0x2ef   :  { %v1153_v10 = vmul.f32 0.015625, %v1091_v41  ;;  %1144 = vadd.xlane.f32.xlu0 %v3318_v38 }
 0x2f0   :  { %v1089_v34 = vpop.xlane.xlu0 %1088 }
 0x2f1   :  { %v1152_v63 = vmul.f32 0.015625, %v1089_v34  ;;  %1274 = vadd.xlane.f32.xlu1 %v1213_v30  ;;  %v1313_v42 = vmul.f32 %v1153_v10, %v1153_v10  ;;  %v1377_v40 = vsub.f32 %v3175_v5, %v1153_v10  ;;  %v3339_v34 = vld [vmem:[%s3694_s5] ss:$0 sm:$0xff] }
 0x2f2   :  { %v1219_v31 = vpop.xlane.xlu1 %1218 }
 0x2f3   :  { %v1281_v8 = vmul.f32 0.015625, %v1219_v31  ;;  %1272 = vadd.xlane.f32.xlu0 %v1212_v12  ;;  %v1312_v37 = vmul.f32 %v1152_v63, %v1152_v63  ;;  %v1376_v12 = vsub.f32 %v3178_v9, %v1152_v63 }
 0x2f4   :  { %v1217_v15 = vpop.xlane.xlu0 %1216 }
 0x2f5   :  { %v1345_v28 = vsub.f32 %v1281_v8, %v1313_v42  ;;  %v1280_v3 = vmul.f32 0.015625, %v1217_v15  ;;  %1150 = vadd.xlane.f32.xlu1 %v3325_v53  ;;  %v3345_v8 = vld [vmem:[%s3695_s6] ss:$0 sm:$0xff] }
 0x2f7   :  { %v1409_v43 = vadd.f32 1e-05, %v1345_v28  ;;  %v1344_v24 = vsub.f32 %v1280_v3, %v1312_v37  ;;  %1148 = vadd.xlane.f32.xlu0 %v3328_v59 }
 0x2f9   :  { %2385 = vrsqrt.f32 %v1409_v43  ;;  %v1408_v54 = vadd.f32 1e-05, %v1344_v24  ;;  %1278 = vadd.xlane.f32.xlu1 %v1215_v58 }
 0x2fa   :  { %v1095_v7 = vpop.xlane.xlu1 %1094 }
 0x2fb   :  { %2387 = vrsqrt.f32 %v1408_v54  ;;  %v1155_v1 = vmul.f32 0.015625, %v1095_v7  ;;  %1276 = vadd.xlane.f32.xlu0 %v1214_v33 }
 0x2fc   :  { %v1093_v57 = vpop.xlane.xlu0 %1092 }
 0x2fd   :  { %v1154_v22 = vmul.f32 0.015625, %v1093_v57  ;;  %v1315_v44 = vmul.f32 %v1155_v1, %v1155_v1 }
 0x2fe   :  { %v1223_v46 = vpop.xlane.xlu1 %1222 }
 0x2ff   :  { %v1283_v17 = vmul.f32 0.015625, %v1223_v46  ;;  %v1314_v51 = vmul.f32 %v1154_v22, %v1154_v22  ;;  %v1379_v46 = vsub.f32 %v3185_v18, %v1155_v1 }
 0x300   :  { %v1221_v62 = vpop.xlane.xlu0 %1220 }
 0x301   :  { %v1347_v21 = vsub.f32 %v1283_v17, %v1315_v44  ;;  %v1282_v19 = vmul.f32 0.015625, %v1221_v62 }
 0x303   :  { %v1411_v0 = vadd.f32 1e-05, %v1347_v21  ;;  %v1346_v14 = vsub.f32 %v1282_v19, %v1314_v51  ;;  %v1378_v21 = vsub.f32 %v3188_v39, %v1154_v22 }
 0x305   :  { %2389 = vrsqrt.f32 %v1411_v0  ;;  %v1410_v41 = vadd.f32 1e-05, %v1346_v14 }
 0x306   :  { %v2386_v30 = vpop.eup %2385 }
 0x307   :  { %2391 = vrsqrt.f32 %v1410_v41  ;;  %v1473_v31 = vmul.f32 %v2386_v30, %v1377_v40 }
 0x308   :  { %v2388_v42 = vpop.eup %2387 }
 0x309   :  { %v1472_v15 = vmul.f32 %v2388_v42, %v1376_v12  ;;  %v1511_v5 = vmul.f32 %v3339_v34, %v1473_v31 }
 0x30a   :  { %v1099_v10 = vpop.xlane.xlu1 %1098 }
 0x30b   :  { %v1157_v37 = vmul.f32 0.015625, %v1099_v10  ;;  %v1510_v28 = vmul.f32 %v3339_v34, %v1472_v15  ;;  %v1549_v58 = vadd.f32 %v3345_v8, %v1511_v5 }
 0x30c   :  { %v1097_v3 = vpop.xlane.xlu0 %1096 }
 0x30d   :  { %v1156_v43 = vmul.f32 0.015625, %v1097_v3  ;;  %v1548_v9 = vadd.f32 %v3345_v8, %v1510_v28  ;;  %v1317_v24 = vmul.f32 %v1157_v37, %v1157_v37  ;;  %v1581_v57 = vmax.f32 %v1549_v58, 0.0 }
 0x30e   :  { %v1227_v63 = vpop.xlane.xlu1 %1226 }
 0x30f   :  { %v1285_v33 = vmul.f32 0.015625, %v1227_v63  ;;  %v1580_v54 = vmax.f32 %v1548_v9, 0.0  ;;  %v1316_v44 = vmul.f32 %v1156_v43, %v1156_v43  ;;  %v1381_v63 = vsub.f32 %v3195_v48, %v1157_v37 }
 0x310   :  { %v1225_v7 = vpop.xlane.xlu0 %1224 }
 0x311   :  { %v1349_v17 = vsub.f32 %v1285_v33, %v1317_v24  ;;  %v1284_v62 = vmul.f32 0.015625, %v1225_v7  ;;  %2238 = vmatprep.mubr.f32.mxu0 %v1580_v54 }
 0x312   :  { %v2390_v51 = vpop.eup %2389  ;;  %2239 = vmatmul.mubr.f32.vlgmr.msra.gmra.mxu0 %v1581_v57  ;;  %v1380_v57 = vsub.f32 %v3198_v13, %v1156_v43 }
 0x313   :  { %v1413_v19 = vadd.f32 1e-05, %v1349_v17  ;;  %v1348_v0 = vsub.f32 %v1284_v62, %v1316_v44  ;;  %v1475_v14 = vmul.f32 %v2390_v51, %v1379_v46 }
 0x314   :  { %v2392_v40 = vpop.eup %2391 }
 0x315   :  { %2393 = vrsqrt.f32 %v1413_v19  ;;  %v1412_v41 = vadd.f32 1e-05, %v1348_v0  ;;  %v1474_v30 = vmul.f32 %v2392_v40, %v1378_v21  ;;  %v1513_v12 = vmul.f32 %v3339_v34, %v1475_v14 }
 0x317   :  { %2395 = vrsqrt.f32 %v1412_v41  ;;  %v1512_v18 = vmul.f32 %v3339_v34, %v1474_v30  ;;  %v1551_v1 = vadd.f32 %v3345_v8, %v1513_v12 }
 0x319   :  { %v1550_v31 = vadd.f32 %v3345_v8, %v1512_v18  ;;  %v1583_v22 = vmax.f32 %v1551_v1, 0.0 }
 0x31a   :  { %v1103_v42 = vpop.xlane.xlu1 %1102 }
 0x31b   :  { %v1159_v15 = vmul.f32 0.015625, %v1103_v42  ;;  %v1582_v5 = vmax.f32 %v1550_v31, 0.0 }
 0x31c   :  { %v1101_v39 = vpop.xlane.xlu0 %1100 }
 0x31d   :  { %v1158_v10 = vmul.f32 0.015625, %v1101_v39  ;;  %2241 = vmatprep.mubr.f32.mxu0 %v1582_v5  ;;  %v1319_v3 = vmul.f32 %v1159_v15, %v1159_v15 }
 0x31e   :  { %v1231_v28 = vpop.xlane.xlu1 %1230  ;;  %2242 = vmatmul.mubr.f32.gmra.mxu0 %v1583_v22 }
 0x31f   :  { %v1287_v58 = vmul.f32 0.015625, %v1231_v28  ;;  %v1318_v24 = vmul.f32 %v1158_v10, %v1158_v10 }
 0x320   :  { %v1229_v9 = vpop.xlane.xlu0 %1228 }
 0x321   :  { %v1351_v33 = vsub.f32 %v1287_v58, %v1319_v3  ;;  %v1286_v54 = vmul.f32 0.015625, %v1229_v9 }
 0x322   :  { %v2394_v7 = vpop.eup %2393 }
 0x323   :  { %v1415_v46 = vadd.f32 1e-05, %v1351_v33  ;;  %v1350_v44 = vsub.f32 %v1286_v54, %v1318_v24  ;;  %v1477_v17 = vmul.f32 %v2394_v7, %v1381_v63  ;;  %v1383_v63 = vsub.f32 %v3205_v36, %v1159_v15 }
 0x324   :  { %v2396_v62 = vpop.eup %2395  ;;  %v1382_v54 = vsub.f32 %v3208_v47, %v1158_v10 }
 0x325   :  { %2397 = vrsqrt.f32 %v1415_v46  ;;  %v1414_v51 = vadd.f32 1e-05, %v1350_v44  ;;  %v1476_v21 = vmul.f32 %v2396_v62, %v1380_v57  ;;  %v1515_v19 = vmul.f32 %v3339_v34, %v1477_v17 }
 0x326   :  { %v1107_v0 = vpop.xlane.xlu1 %1106 }
 0x327   :  { %2399 = vrsqrt.f32 %v1414_v51  ;;  %v3360_v14 = vmul.f32 0.015625, %v1107_v0  ;;  %v1514_v48 = vmul.f32 %v3339_v34, %v1476_v21  ;;  %v1553_v40 = vadd.f32 %v3345_v8, %v1515_v19 }
 0x328   :  { %v1105_v37 = vpop.xlane.xlu0 %1104 }
 0x329   :  { %v3364_v41 = vmul.f32 0.015625, %v1105_v37  ;;  %v1552_v13 = vadd.f32 %v3345_v8, %v1514_v48  ;;  %v1321_v30 = vmul.f32 %v3360_v14, %v3360_v14  ;;  %v1585_v31 = vmax.f32 %v1553_v40, 0.0 }
 0x32a   :  { %v1235_v43 = vpop.xlane.xlu1 %1234 }
 0x32b   :  { %v1289_v12 = vmul.f32 0.015625, %v1235_v43  ;;  %v1584_v18 = vmax.f32 %v1552_v13, 0.0  ;;  %v1320_v42 = vmul.f32 %v3364_v41, %v3364_v41 }
 0x32c   :  { %v1233_v1 = vpop.xlane.xlu0 %1232 }
 0x32d   :  { %v1353_v5 = vsub.f32 %v1289_v12, %v1321_v30  ;;  %v1288_v39 = vmul.f32 0.015625, %v1233_v1  ;;  %2244 = vmatprep.mubr.f32.mxu0 %v1584_v18 }
 0x32e   :  { %v1111_v22 = vpop.xlane.xlu1 %1110  ;;  %2245 = vmatmul.mubr.f32.gmra.mxu0 %v1585_v31 }
 0x32f   :  { %v1417_v28 = vadd.f32 1e-05, %v1353_v5  ;;  %v1352_v3 = vsub.f32 %v1288_v39, %v1320_v42  ;;  %v3371_v58 = vmul.f32 0.015625, %v1111_v22  ;;  %v1385_v5 = vsub.f32 %v3215_v49, %v3360_v14 }
 0x330   :  { %v1109_v9 = vpop.xlane.xlu0 %1108  ;;  %v1384_v49 = vsub.f32 %v3218_v26, %v3364_v41 }
 0x331   :  { %2401 = vrsqrt.f32 %v1417_v28  ;;  %v1416_v24 = vadd.f32 1e-05, %v1352_v3  ;;  %v3375_v7 = vmul.f32 0.015625, %v1109_v9  ;;  %v1323_v46 = vmul.f32 %v3371_v58, %v3371_v58 }
 0x332   :  { %v2398_v33 = vpop.eup %2397  ;;  %v1239_v57 = vpop.xlane.xlu1 %1238 }
 0x333   :  { %2403 = vrsqrt.f32 %v1416_v24  ;;  %v1291_v44 = vmul.f32 0.015625, %v1239_v57  ;;  %v1479_v17 = vmul.f32 %v2398_v33, %v1383_v63  ;;  %v1322_v51 = vmul.f32 %v3375_v7, %v3375_v7 }
 0x334   :  { %v2400_v62 = vpop.eup %2399  ;;  %v1237_v21 = vpop.xlane.xlu0 %1236 }
 0x335   :  { %v1355_v36 = vsub.f32 %v1291_v44, %v1323_v46  ;;  %v1290_v15 = vmul.f32 0.015625, %v1237_v21  ;;  %v1478_v19 = vmul.f32 %v2400_v62, %v1382_v54  ;;  %v1517_v0 = vmul.f32 %v3339_v34, %v1479_v17 }
 0x336   :  { %v1115_v47 = vpop.xlane.xlu1 %1114 }
 0x337   :  { %v1419_v10 = vadd.f32 1e-05, %v1355_v36  ;;  %v1354_v48 = vsub.f32 %v1290_v15, %v1322_v51  ;;  %v3382_v37 = vmul.f32 0.015625, %v1115_v47  ;;  %v1516_v40 = vmul.f32 %v3339_v34, %v1478_v19 }
 0x338   :  { %v1113_v13 = vpop.xlane.xlu0 %1112  ;;  %v1555_v30 = vadd.f32 %v3345_v8, %v1517_v0  ;;  %v1387_v47 = vsub.f32 %v3225_v6, %v3371_v58  ;;  %v1386_v58 = vsub.f32 %v3228_v2, %v3375_v7 }
 0x339   :  { %2405 = vrsqrt.f32 %v1419_v10  ;;  %v1418_v43 = vadd.f32 1e-05, %v1354_v48  ;;  %v3386_v12 = vmul.f32 0.015625, %v1113_v13  ;;  %v1554_v1 = vadd.f32 %v3345_v8, %v1516_v40 }
 0x33a   :  { %v1243_v18 = vpop.xlane.xlu1 %1242  ;;  %v1325_v31 = vmul.f32 %v3382_v37, %v3382_v37  ;;  %v1587_v63 = vmax.f32 %v1555_v30, 0.0  ;;  %v1389_v2 = vsub.f32 %v3235_v11, %v3382_v37 }
 0x33b   :  { %2407 = vrsqrt.f32 %v1418_v43  ;;  %v1293_v42 = vmul.f32 0.015625, %v1243_v18  ;;  %v1586_v22 = vmax.f32 %v1554_v1, 0.0  ;;  %v1324_v28 = vmul.f32 %v3386_v12, %v3386_v12 }
 0x33c   :  { %v1241_v39 = vpop.xlane.xlu0 %1240  ;;  %v1388_v37 = vsub.f32 %v3238_v32, %v3386_v12 }
 0x33d   :  { %v1357_v3 = vsub.f32 %v1293_v42, %v1325_v31  ;;  %v1292_v9 = vmul.f32 0.015625, %v1241_v39  ;;  %2247 = vmatprep.mubr.f32.mxu0 %v1586_v22 }
 0x33e   :  { %v2402_v24 = vpop.eup %2401  ;;  %v1119_v33 = vpop.xlane.xlu1 %1118  ;;  %2248 = vmatmul.mubr.f32.gmra.mxu0 %v1587_v63 }
 0x33f   :  { %v1421_v54 = vadd.f32 1e-05, %v1357_v3  ;;  %v1356_v57 = vsub.f32 %v1292_v9, %v1324_v28  ;;  %v3395_v46 = vmul.f32 0.015625, %v1119_v33  ;;  %v1481_v44 = vmul.f32 %v2402_v24, %v1385_v5 }
 0x340   :  { %v2404_v17 = vpop.eup %2403  ;;  %v1117_v14 = vpop.xlane.xlu0 %1116 }
 0x341   :  { %2409 = vrsqrt.f32 %v1421_v54  ;;  %v1420_v62 = vadd.f32 1e-05, %v1356_v57  ;;  %v3399_v51 = vmul.f32 0.015625, %v1117_v14  ;;  %v1480_v36 = vmul.f32 %v2404_v17, %v1384_v49 }
 0x342   :  { %v1247_v21 = vpop.xlane.xlu1 %1246  ;;  %v1519_v15 = vmul.f32 %v3339_v34, %v1481_v44  ;;  %v1327_v19 = vmul.f32 %v3395_v46, %v3395_v46  ;;  %v1391_v32 = vsub.f32 %v3245_v23, %v3395_v46 }
 0x343   :  { %2411 = vrsqrt.f32 %v1420_v62  ;;  %v1295_v0 = vmul.f32 0.015625, %v1247_v21  ;;  %v1518_v26 = vmul.f32 %v3339_v34, %v1480_v36  ;;  %v1326_v41 = vmul.f32 %v3399_v51, %v3399_v51 }
 0x344   :  { %v1245_v10 = vpop.xlane.xlu0 %1244  ;;  %v1557_v13 = vadd.f32 %v3345_v8, %v1519_v15  ;;  %v1390_v46 = vsub.f32 %v3248_v60, %v3399_v51 }
 0x345   :  { %v1359_v48 = vsub.f32 %v1295_v0, %v1327_v19  ;;  %v1294_v40 = vmul.f32 0.015625, %v1245_v10  ;;  %v1556_v18 = vadd.f32 %v3345_v8, %v1518_v26 }
 0x346   :  { %v2406_v43 = vpop.eup %2405  ;;  %v1123_v30 = vpop.xlane.xlu1 %1122  ;;  %v1589_v3 = vmax.f32 %v1557_v13, 0.0 }
 0x347   :  { %v1423_v1 = vadd.f32 1e-05, %v1359_v48  ;;  %v1358_v31 = vsub.f32 %v1294_v40, %v1326_v41  ;;  %v3411_v42 = vmul.f32 0.015625, %v1123_v30  ;;  %v1483_v5 = vmul.f32 %v2406_v43, %v1387_v47 }
 0x348   :  { %v2408_v6 = vpop.eup %2407  ;;  %v1121_v39 = vpop.xlane.xlu0 %1120  ;;  %v1588_v22 = vmax.f32 %v1556_v18, 0.0 }
 0x349   :  { %2413 = vrsqrt.f32 %v1423_v1  ;;  %v1422_v28 = vadd.f32 1e-05, %v1358_v31  ;;  %v3415_v9 = vmul.f32 0.015625, %v1121_v39  ;;  %v1482_v24 = vmul.f32 %v2408_v6, %v1386_v58 }
 0x34a   :  { %2250 = vmatprep.mubr.f32.mxu0 %v1588_v22  ;;  %v1251_v63 = vpop.xlane.xlu1 %1250  ;;  %v1521_v33 = vmul.f32 %v3339_v34, %v1483_v5  ;;  %v1329_v54 = vmul.f32 %v3411_v42, %v3411_v42  ;;  %v1393_v60 = vsub.f32 %v3255_v50, %v3411_v42 }
 0x34b   :  { %2415 = vrsqrt.f32 %v1422_v28  ;;  %v1297_v57 = vmul.f32 0.015625, %v1251_v63  ;;  %2251 = vmatmul.mubr.f32.gmra.mxu0 %v1589_v3  ;;  %v1520_v44 = vmul.f32 %v3339_v34, %v1482_v24  ;;  %v1328_v17 = vmul.f32 %v3415_v9, %v3415_v9 }
 0x34c   :  { %v1249_v7 = vpop.xlane.xlu0 %1248  ;;  %v1559_v62 = vadd.f32 %v3345_v8, %v1521_v33  ;;  %v1392_v42 = vsub.f32 %v3258_v56, %v3415_v9 }
 0x34d   :  { %v1361_v49 = vsub.f32 %v1297_v57, %v1329_v54  ;;  %v1296_v14 = vmul.f32 0.015625, %v1249_v7  ;;  %v1558_v15 = vadd.f32 %v3345_v8, %v1520_v44 }
 0x34e   :  { %v2410_v21 = vpop.eup %2409  ;;  %v1127_v36 = vpop.xlane.xlu1 %1126  ;;  %v1591_v40 = vmax.f32 %v1559_v62, 0.0 }
 0x34f   :  { %v1425_v19 = vadd.f32 1e-05, %v1361_v49  ;;  %v1360_v0 = vsub.f32 %v1296_v14, %v1328_v17  ;;  %v3427_v47 = vmul.f32 0.015625, %v1127_v36  ;;  %v1485_v10 = vmul.f32 %v2410_v21, %v1389_v2 }
 0x350   :  { %v2412_v11 = vpop.eup %2411  ;;  %v1125_v26 = vpop.xlane.xlu0 %1124  ;;  %v1590_v41 = vmax.f32 %v1558_v15, 0.0 }
 0x351   :  { %2417 = vrsqrt.f32 %v1425_v19  ;;  %v1424_v48 = vadd.f32 1e-05, %v1360_v0  ;;  %v3431_v13 = vmul.f32 0.015625, %v1125_v26  ;;  %v1484_v30 = vmul.f32 %v2412_v11, %v1388_v37 }
 0x352   :  { %2253 = vmatprep.mubr.f32.mxu0 %v1590_v41  ;;  %v1255_v43 = vpop.xlane.xlu1 %1254  ;;  %v1523_v18 = vmul.f32 %v3339_v34, %v1485_v10  ;;  %v1331_v1 = vmul.f32 %v3427_v47, %v3427_v47  ;;  %v1395_v56 = vsub.f32 %v3265_v61, %v3427_v47 }
 0x353   :  { %2419 = vrsqrt.f32 %v1424_v48  ;;  %v1299_v31 = vmul.f32 0.015625, %v1255_v43  ;;  %2254 = vmatmul.mubr.f32.gmra.mxu0 %v1591_v40  ;;  %v1522_v5 = vmul.f32 %v3339_v34, %v1484_v30  ;;  %v1330_v6 = vmul.f32 %v3431_v13, %v3431_v13 }
 0x354   :  { %v1253_v12 = vpop.xlane.xlu0 %1252  ;;  %v1561_v22 = vadd.f32 %v3345_v8, %v1523_v18  ;;  %v1394_v47 = vsub.f32 %v3268_v16, %v3431_v13 }
 0x355   :  { %v1363_v58 = vsub.f32 %v1299_v31, %v1331_v1  ;;  %v1298_v39 = vmul.f32 0.015625, %v1253_v12  ;;  %v1560_v63 = vadd.f32 %v3345_v8, %v1522_v5 }
 0x356   :  { %v2414_v28 = vpop.eup %2413  ;;  %v1131_v3 = vpop.xlane.xlu1 %1130  ;;  %v1593_v17 = vmax.f32 %v1561_v22, 0.0 }
 0x357   :  { %v1427_v24 = vadd.f32 1e-05, %v1363_v58  ;;  %v1362_v33 = vsub.f32 %v1298_v39, %v1330_v6  ;;  %v3443_v54 = vmul.f32 0.015625, %v1131_v3  ;;  %v1487_v57 = vmul.f32 %v2414_v28, %v1391_v32 }
 0x358   :  { %v2416_v23 = vpop.eup %2415  ;;  %v1129_v2 = vpop.xlane.xlu0 %1128  ;;  %v1592_v7 = vmax.f32 %v1560_v63, 0.0 }
 0x359   :  { %2421 = vrsqrt.f32 %v1427_v24  ;;  %v1426_v44 = vadd.f32 1e-05, %v1362_v33  ;;  %v3447_v49 = vmul.f32 0.015625, %v1129_v2  ;;  %v1486_v62 = vmul.f32 %v2416_v23, %v1390_v46 }
 0x35a   :  { %2256 = vmatprep.mubr.f32.mxu0 %v1592_v7  ;;  %v1259_v14 = vpop.xlane.xlu1 %1258  ;;  %v1525_v21 = vmul.f32 %v3339_v34, %v1487_v57  ;;  %v1333_v36 = vmul.f32 %v3443_v54, %v3443_v54  ;;  %v1397_v16 = vsub.f32 %v3275_v55, %v3443_v54 }
 0x35b   :  { %2423 = vrsqrt.f32 %v1426_v44  ;;  %v1301_v15 = vmul.f32 0.015625, %v1259_v14  ;;  %2257 = vmatmul.mubr.f32.gmra.mxu0 %v1593_v17  ;;  %v1524_v19 = vmul.f32 %v3339_v34, %v1486_v62  ;;  %v1332_v0 = vmul.f32 %v3447_v49, %v3447_v49 }
 0x35c   :  { %v1257_v51 = vpop.xlane.xlu0 %1256  ;;  %v1563_v37 = vadd.f32 %v3345_v8, %v1525_v21  ;;  %v1396_v54 = vsub.f32 %v3278_v25, %v3447_v49 }
 0x35d   :  { %v1365_v10 = vsub.f32 %v1301_v15, %v1333_v36  ;;  %v1300_v11 = vmul.f32 0.015625, %v1257_v51  ;;  %v1562_v48 = vadd.f32 %v3345_v8, %v1524_v19 }
 0x35e   :  { %v2418_v26 = vpop.eup %2417  ;;  %v1135_v41 = vpop.xlane.xlu1 %1134  ;;  %v1595_v12 = vmax.f32 %v1563_v37, 0.0 }
 0x35f   :  { %v1429_v40 = vadd.f32 1e-05, %v1365_v10  ;;  %v1364_v43 = vsub.f32 %v1300_v11, %v1332_v0  ;;  %v3459_v30 = vmul.f32 0.015625, %v1135_v41  ;;  %v1489_v18 = vmul.f32 %v2418_v26, %v1393_v60 }
 0x360   :  { %v2420_v50 = vpop.eup %2419  ;;  %v1133_v1 = vpop.xlane.xlu0 %1132  ;;  %v1594_v31 = vmax.f32 %v1562_v48, 0.0 }
 0x361   :  { %2425 = vrsqrt.f32 %v1429_v40  ;;  %v1428_v32 = vadd.f32 1e-05, %v1364_v43  ;;  %v3463_v5 = vmul.f32 0.015625, %v1133_v1  ;;  %v1488_v58 = vmul.f32 %v2420_v50, %v1392_v42 }
 0x362   :  { %2259 = vmatprep.mubr.f32.mxu0 %v1594_v31  ;;  %v1263_v6 = vpop.xlane.xlu1 %1262  ;;  %v1527_v39 = vmul.f32 %v3339_v34, %v1489_v18  ;;  %v1335_v22 = vmul.f32 %v3459_v30, %v3459_v30  ;;  %v1399_v25 = vsub.f32 %v3285_v45, %v3459_v30 }
 0x363   :  { %2427 = vrsqrt.f32 %v1428_v32  ;;  %v1303_v28 = vmul.f32 0.015625, %v1263_v6  ;;  %2260 = vmatmul.mubr.f32.gmra.mxu0 %v1595_v12  ;;  %v1526_v3 = vmul.f32 %v3339_v34, %v1488_v58  ;;  %v1334_v63 = vmul.f32 %v3463_v5, %v3463_v5 }
 0x364   :  { %v1261_v9 = vpop.xlane.xlu0 %1260  ;;  %v1565_v57 = vadd.f32 %v3345_v8, %v1527_v39  ;;  %v1398_v30 = vsub.f32 %v3288_v20, %v3463_v5 }
 0x365   :  { %v1367_v24 = vsub.f32 %v1303_v28, %v1335_v22  ;;  %v1302_v33 = vmul.f32 0.015625, %v1261_v9  ;;  %v1564_v2 = vadd.f32 %v3345_v8, %v1526_v3 }
 0x366   :  { %v2422_v23 = vpop.eup %2421  ;;  %v1139_v46 = vpop.xlane.xlu1 %1138  ;;  %v1597_v15 = vmax.f32 %v1565_v57, 0.0 }
 0x367   :  { %v1431_v7 = vadd.f32 1e-05, %v1367_v24  ;;  %v1366_v44 = vsub.f32 %v1302_v33, %v1334_v63  ;;  %v3475_v17 = vmul.f32 0.015625, %v1139_v46  ;;  %v1491_v14 = vmul.f32 %v2422_v23, %v1395_v56 }
 0x368   :  { %v2424_v61 = vpop.eup %2423  ;;  %v1137_v62 = vpop.xlane.xlu0 %1136  ;;  %v1596_v21 = vmax.f32 %v1564_v2, 0.0 }
 0x369   :  { %2429 = vrsqrt.f32 %v1431_v7  ;;  %v1430_v36 = vadd.f32 1e-05, %v1366_v44  ;;  %v3479_v60 = vmul.f32 0.015625, %v1137_v62  ;;  %v1490_v19 = vmul.f32 %v2424_v61, %v1394_v47 }
 0x36a   :  { %2262 = vmatprep.mubr.f32.mxu0 %v1596_v21  ;;  %v1267_v51 = vpop.xlane.xlu1 %1266  ;;  %v1529_v0 = vmul.f32 %v3339_v34, %v1491_v14  ;;  %v1337_v10 = vmul.f32 %v3475_v17, %v3475_v17  ;;  %v1401_v20 = vsub.f32 %v3295_v29, %v3475_v17 }
 0x36b   :  { %2431 = vrsqrt.f32 %v1430_v36  ;;  %v1305_v11 = vmul.f32 0.015625, %v1267_v51  ;;  %2263 = vmatmul.mubr.f32.gmra.mxu0 %v1597_v15  ;;  %v1528_v37 = vmul.f32 %v3339_v34, %v1490_v19  ;;  %v1336_v26 = vmul.f32 %v3479_v60, %v3479_v60 }
 0x36c   :  { %v1265_v13 = vpop.xlane.xlu0 %1264  ;;  %v1567_v40 = vadd.f32 %v3345_v8, %v1529_v0  ;;  %v1400_v17 = vsub.f32 %v3298_v35, %v3479_v60 }
 0x36d   :  { %v1369_v41 = vsub.f32 %v1305_v11, %v1337_v10  ;;  %v1304_v48 = vmul.f32 0.015625, %v1265_v13  ;;  %v1566_v50 = vadd.f32 %v3345_v8, %v1528_v37 }
 0x36e   :  { %v2426_v43 = vpop.eup %2425  ;;  %v1143_v18 = vpop.xlane.xlu1 %1142  ;;  %v1599_v39 = vmax.f32 %v1567_v40, 0.0 }
 0x36f   :  { %v1433_v42 = vadd.f32 1e-05, %v1369_v41  ;;  %v1368_v1 = vsub.f32 %v1304_v48, %v1336_v26  ;;  %v3491_v31 = vmul.f32 0.015625, %v1143_v18  ;;  %v1493_v32 = vmul.f32 %v2426_v43, %v1397_v16 }
 0x370   :  { %v2428_v55 = vpop.eup %2427  ;;  %v1141_v12 = vpop.xlane.xlu0 %1140  ;;  %v1598_v6 = vmax.f32 %v1566_v50, 0.0 }
 0x371   :  { %2433 = vrsqrt.f32 %v1433_v42  ;;  %v1432_v58 = vadd.f32 1e-05, %v1368_v1  ;;  %v3495_v22 = vmul.f32 0.015625, %v1141_v12  ;;  %v1492_v56 = vmul.f32 %v2428_v55, %v1396_v54 }
 0x372   :  { %2265 = vmatprep.mubr.f32.mxu0 %v1598_v6  ;;  %v1271_v28 = vpop.xlane.xlu1 %1270  ;;  %v1531_v9 = vmul.f32 %v3339_v34, %v1493_v32  ;;  %v1339_v3 = vmul.f32 %v3491_v31, %v3491_v31 }
 0x373   :  { %2435 = vrsqrt.f32 %v1432_v58  ;;  %v1307_v63 = vmul.f32 0.015625, %v1271_v28  ;;  %2266 = vmatmul.mubr.f32.gmra.mxu0 %v1599_v39  ;;  %v1530_v24 = vmul.f32 %v3339_v34, %v1492_v56  ;;  %v1338_v33 = vmul.f32 %v3495_v22, %v3495_v22 }
 0x374   :  { %v1269_v49 = vpop.xlane.xlu0 %1268  ;;  %v1569_v46 = vadd.f32 %v3345_v8, %v1531_v9 }
 0x375   :  { %v1371_v57 = vsub.f32 %v1307_v63, %v1339_v3  ;;  %v1306_v23 = vmul.f32 0.015625, %v1269_v49  ;;  %v1568_v44 = vadd.f32 %v3345_v8, %v1530_v24  ;;  %v1403_v49 = vsub.f32 %v3305_v4, %v3491_v31 }
 0x376   :  { %v2430_v2 = vpop.eup %2429  ;;  %v1147_v7 = vpop.xlane.xlu1 %1146  ;;  %v1601_v51 = vmax.f32 %v1569_v46, 0.0 }
 0x377   :  { %v1435_v14 = vadd.f32 1e-05, %v1371_v57  ;;  %v1370_v61 = vsub.f32 %v1306_v23, %v1338_v33  ;;  %v3507_v47 = vmul.f32 0.015625, %v1147_v7  ;;  %v1495_v62 = vmul.f32 %v2430_v2, %v1399_v25 }
 0x378   :  { %v2432_v45 = vpop.eup %2431  ;;  %v1145_v21 = vpop.xlane.xlu0 %1144  ;;  %v1600_v36 = vmax.f32 %v1568_v44, 0.0  ;;  %v1402_v2 = vsub.f32 %v3308_v27, %v3495_v22 }
 0x379   :  { %2437 = vrsqrt.f32 %v1435_v14  ;;  %v1434_v15 = vadd.f32 1e-05, %v1370_v61  ;;  %v3511_v19 = vmul.f32 0.015625, %v1145_v21  ;;  %v1494_v10 = vmul.f32 %v2432_v45, %v1398_v30 }
 0x37a   :  { %2268 = vmatprep.mubr.f32.mxu0 %v1600_v36  ;;  %v1275_v0 = vpop.xlane.xlu1 %1274  ;;  %v1533_v11 = vmul.f32 %v3339_v34, %v1495_v62  ;;  %v1341_v16 = vmul.f32 %v3507_v47, %v3507_v47  ;;  %v1405_v27 = vsub.f32 %v3315_v52, %v3507_v47 }
 0x37b   :  { %2439 = vrsqrt.f32 %v1434_v15  ;;  %v1309_v13 = vmul.f32 0.015625, %v1275_v0  ;;  %2269 = vmatmul.mubr.f32.gmra.mxu0 %v1601_v51  ;;  %v1532_v37 = vmul.f32 %v3339_v34, %v1494_v10  ;;  %v1340_v26 = vmul.f32 %v3511_v19, %v3511_v19 }
 0x37c   :  { %v1273_v5 = vpop.xlane.xlu0 %1272  ;;  %v1571_v40 = vadd.f32 %v3345_v8, %v1533_v11  ;;  %v1404_v51 = vsub.f32 %v3318_v38, %v3511_v19 }
 0x37d   :  { %v1373_v41 = vsub.f32 %v1309_v13, %v1341_v16  ;;  %v1308_v48 = vmul.f32 0.015625, %v1273_v5  ;;  %v1570_v50 = vadd.f32 %v3345_v8, %v1532_v37 }
 0x37e   :  { %v2434_v43 = vpop.eup %2433  ;;  %v1151_v18 = vpop.xlane.xlu1 %1150  ;;  %v1603_v58 = vmax.f32 %v1571_v40, 0.0 }
 0x37f   :  { %v1437_v42 = vadd.f32 1e-05, %v1373_v41  ;;  %v1372_v1 = vsub.f32 %v1308_v48, %v1340_v26  ;;  %v3523_v32 = vmul.f32 0.015625, %v1151_v18  ;;  %v1497_v55 = vmul.f32 %v2434_v43, %v1401_v20 }
 0x380   :  { %v2436_v29 = vpop.eup %2435  ;;  %v1149_v54 = vpop.xlane.xlu0 %1148  ;;  %v1602_v12 = vmax.f32 %v1570_v50, 0.0 }
 0x381   :  { %2441 = vrsqrt.f32 %v1437_v42  ;;  %v1436_v6 = vadd.f32 1e-05, %v1372_v1  ;;  %v1182_v39 = vmul.f32 0.015625, %v1149_v54  ;;  %v1496_v56 = vmul.f32 %v2436_v29, %v1400_v17 }
 0x382   :  { %2271 = vmatprep.mubr.f32.mxu0 %v1602_v12  ;;  %v1279_v28 = vpop.xlane.xlu1 %1278  ;;  %v1535_v9 = vmul.f32 %v3339_v34, %v1497_v55  ;;  %v1343_v3 = vmul.f32 %v3523_v32, %v3523_v32  ;;  %v1407_v52 = vsub.f32 %v3325_v53, %v3523_v32 }
 0x383   :  { %2443 = vrsqrt.f32 %v1436_v6  ;;  %v1311_v63 = vmul.f32 0.015625, %v1279_v28  ;;  %2272 = vmatmul.mubr.f32.gmra.mxu0 %v1603_v58  ;;  %v1534_v35 = vmul.f32 %v3339_v34, %v1496_v56  ;;  %v1342_v24 = vmul.f32 %v1182_v39, %v1182_v39 }
 0x384   :  { %v1277_v25 = vpop.xlane.xlu0 %1276  ;;  %v1573_v60 = vadd.f32 %v3345_v8, %v1535_v9  ;;  %v1406_v38 = vsub.f32 %v3328_v59, %v1182_v39  ;;  %v3559_v59 = vld [vmem:[%s3697_s8] ss:$0 sm:$0xff] }
 0x385   :  { %v1375_v33 = vsub.f32 %v1311_v63, %v1343_v3  ;;  %v1310_v57 = vmul.f32 0.015625, %v1277_v25  ;;  %v1572_v46 = vadd.f32 %v3345_v8, %v1534_v35 }
 0x386   :  { %v2438_v23 = vpop.eup %2437  ;;  %v1605_v45 = vmax.f32 %v1573_v60, 0.0 }
 0x387   :  { %v1439_v7 = vadd.f32 1e-05, %v1375_v33  ;;  %v1374_v44 = vsub.f32 %v1310_v57, %v1342_v24  ;;  %v1499_v14 = vmul.f32 %v2438_v23, %v1403_v49  ;;  %v1604_v62 = vmax.f32 %v1572_v46, 0.0 }
 0x388   :  { %v2440_v61 = vpop.eup %2439 }
 0x389   :  { %2445 = vrsqrt.f32 %v1439_v7  ;;  %v1438_v30 = vadd.f32 1e-05, %v1374_v44  ;;  %v1498_v21 = vmul.f32 %v2440_v61, %v1402_v2  ;;  %v1537_v4 = vmul.f32 %v3339_v34, %v1499_v14  ;;  %2274 = vmatprep.mubr.f32.mxu0 %v1604_v62 }
 0x38a   :  { %2275 = vmatmul.mubr.f32.gmra.mxu0 %v1605_v45 }
 0x38b   :  { %2447 = vrsqrt.f32 %v1438_v30  ;;  %v1536_v31 = vmul.f32 %v3339_v34, %v1498_v21  ;;  %v1575_v36 = vadd.f32 %v3345_v8, %v1537_v4 }
 0x38d   :  { %v1574_v22 = vadd.f32 %v3345_v8, %v1536_v31  ;;  %v1607_v16 = vmax.f32 %v1575_v36, 0.0 }
 0x38e   :  { %v2442_v15 = vpop.eup %2441 }
 0x38f   :  { %v1606_v0 = vmax.f32 %v1574_v22, 0.0  ;;  %v1501_v10 = vmul.f32 %v2442_v15, %v1405_v27 }
 0x390   :  { %v2444_v11 = vpop.eup %2443 }
 0x391   :  { %2277 = vmatprep.mubr.f32.mxu0 %v1606_v0  ;;  %v1500_v13 = vmul.f32 %v2444_v11, %v1404_v51  ;;  %v1539_v20 = vmul.f32 %v3339_v34, %v1501_v10 }
 0x392   :  { %2278 = vmatmul.mubr.f32.gmra.mxu0 %v1607_v16 }
 0x393   :  { %v1538_v5 = vmul.f32 %v3339_v34, %v1500_v13  ;;  %v1577_v37 = vadd.f32 %v3345_v8, %v1539_v20 }
 0x395   :  { %v1576_v47 = vadd.f32 %v3345_v8, %v1538_v5  ;;  %v1609_v40 = vmax.f32 %v1577_v37, 0.0 }
 0x396   :  { %v2446_v26 = vpop.eup %2445 }
 0x397   :  { %v1608_v19 = vmax.f32 %v1576_v47, 0.0  ;;  %v1503_v41 = vmul.f32 %v2446_v26, %v1407_v52 }
 0x398   :  { %v2448_v48 = vpop.eup %2447 }
 0x399   :  { %2280 = vmatprep.mubr.f32.mxu0 %v1608_v19  ;;  %v1502_v43 = vmul.f32 %v2448_v48, %v1406_v38  ;;  %v1541_v18 = vmul.f32 %v3339_v34, %v1503_v41 }
 0x39a   :  { %2281 = vmatmul.mubr.f32.gmra.mxu0 %v1609_v40 }
 0x39b   :  { %v1540_v50 = vmul.f32 %v3339_v34, %v1502_v43  ;;  %v1579_v42 = vadd.f32 %v3345_v8, %v1541_v18 }
 0x39d   :  { %v1578_v53 = vadd.f32 %v3345_v8, %v1540_v50  ;;  %v1611_v32 = vmax.f32 %v1579_v42, 0.0 }
 0x39f   :  { %v1610_v1 = vmax.f32 %v1578_v53, 0.0 }
 0x3a1   :  { %2283 = vmatprep.mubr.f32.mxu0 %v1610_v1 }
 0x3a2   :  { %2284 = vmatmul.mubr.f32.gmra.mxu0 %v1611_v32 }
 0x3d2   :  { %v2240_v55 = vpop.f32.mrf.mxu0 }
 0x3d3   :  { %v1707_v29 = vadd.f32 %v2240_v55, %v3559_v59 }
 0x3d4   :  { %v1701_v17 = vpop.f32.mrf.mxu0 }
 0x3d5   :  { %1861 = vst [vmem:[%s3698_s9 + $0x8] sm:$0xff] %v1707_v29  ;;  %v1702_v34 = vadd.f32 %v3559_v59, %v1701_v17 }
 0x3d7   :  { %1860 = vst [vmem:[%s3698_s9] sm:$0xff] %v1702_v34 }
 0x3de   :  { %v2243_v8 = vpop.f32.mrf.mxu0 }
 0x3df   :  { %v1717_v54 = vadd.f32 %v2243_v8, %v3559_v59 }
 0x3e0   :  { %v1711_v12 = vpop.f32.mrf.mxu0 }
 0x3e1   :  { %1863 = vst [vmem:[%s3698_s9 + $0x18] sm:$0xff] %v1717_v54  ;;  %v1712_v6 = vadd.f32 %v3559_v59, %v1711_v12 }
 0x3e3   :  { %1862 = vst [vmem:[%s3698_s9 + $0x10] sm:$0xff] %v1712_v6 }
 0x3ee   :  { %v2246_v58 = vpop.f32.mrf.mxu0 }
 0x3ef   :  { %v1727_v39 = vadd.f32 %v2246_v58, %v3559_v59 }
 0x3f0   :  { %v1721_v28 = vpop.f32.mrf.mxu0 }
 0x3f1   :  { %1865 = vst [vmem:[%s3698_s9 + $0x28] sm:$0xff] %v1727_v39  ;;  %v1722_v56 = vadd.f32 %v3559_v59, %v1721_v28 }
 0x3f3   :  { %1864 = vst [vmem:[%s3698_s9 + $0x20] sm:$0xff] %v1722_v56 }
 0x3fe   :  { %v2249_v9 = vpop.f32.mrf.mxu0 }
 0x3ff   :  { %v1737_v3 = vadd.f32 %v2249_v9, %v3559_v59 }
 0x400   :  { %v1731_v63 = vpop.f32.mrf.mxu0 }
 0x401   :  { %1867 = vst [vmem:[%s3698_s9 + $0x38] sm:$0xff] %v1737_v3  ;;  %v1732_v25 = vadd.f32 %v3559_v59, %v1731_v63 }
 0x403   :  { %1866 = vst [vmem:[%s3698_s9 + $0x30] sm:$0xff] %v1732_v25 }
 0x40b   :  { %v2252_v35 = vpop.f32.mrf.mxu0 }
 0x40c   :  { %v1747_v60 = vadd.f32 %v2252_v35, %v3559_v59 }
 0x40d   :  { %v1741_v49 = vpop.f32.mrf.mxu0 }
 0x40e   :  { %1869 = vst [vmem:[%s3698_s9 + $0x48] sm:$0xff] %v1747_v60  ;;  %v1742_v24 = vadd.f32 %v3559_v59, %v1741_v49 }
 0x410   :  { %1868 = vst [vmem:[%s3698_s9 + $0x40] sm:$0xff] %v1742_v24 }
 0x413   :  { %v2255_v33 = vpop.f32.mrf.mxu0 }
 0x414   :  { %v1757_v57 = vadd.f32 %v2255_v33, %v3559_v59 }
 0x415   :  { %v1751_v23 = vpop.f32.mrf.mxu0 }
 0x416   :  { %1871 = vst [vmem:[%s3698_s9 + $0x58] sm:$0xff] %v1757_v57  ;;  %v1752_v46 = vadd.f32 %v3559_v59, %v1751_v23 }
 0x418   :  { %1870 = vst [vmem:[%s3698_s9 + $0x50] sm:$0xff] %v1752_v46 }
 0x41b   :  { %v2258_v2 = vpop.f32.mrf.mxu0 }
 0x41c   :  { %v1767_v7 = vadd.f32 %v2258_v2, %v3559_v59 }
 0x41d   :  { %v1761_v44 = vpop.f32.mrf.mxu0 }
 0x41e   :  { %1873 = vst [vmem:[%s3698_s9 + $0x68] sm:$0xff] %v1767_v7  ;;  %v1762_v14 = vadd.f32 %v3559_v59, %v1761_v44 }
 0x420   :  { %1872 = vst [vmem:[%s3698_s9 + $0x60] sm:$0xff] %v1762_v14 }
 0x423   :  { %v2261_v61 = vpop.f32.mrf.mxu0 }
 0x424   :  { %v1777_v62 = vadd.f32 %v2261_v61, %v3559_v59 }
 0x425   :  { %v1771_v45 = vpop.f32.mrf.mxu0 }
 0x426   :  { %1875 = vst [vmem:[%s3698_s9 + $0x78] sm:$0xff] %v1777_v62  ;;  %v1772_v30 = vadd.f32 %v3559_v59, %v1771_v45 }
 0x428   :  { %1874 = vst [vmem:[%s3698_s9 + $0x70] sm:$0xff] %v1772_v30 }
 0x42b   :  { %v2264_v21 = vpop.f32.mrf.mxu0 }
 0x42c   :  { %v1787_v4 = vadd.f32 %v2264_v21, %v3559_v59 }
 0x42d   :  { %v1781_v31 = vpop.f32.mrf.mxu0 }
 0x42e   :  { %1877 = vst [vmem:[%s3698_s9 + $0x88] sm:$0xff] %v1787_v4  ;;  %v1782_v36 = vadd.f32 %v3559_v59, %v1781_v31 }
 0x430   :  { %1876 = vst [vmem:[%s3698_s9 + $0x80] sm:$0xff] %v1782_v36 }
 0x433   :  { %v2267_v27 = vpop.f32.mrf.mxu0 }
 0x434   :  { %v1797_v22 = vadd.f32 %v2267_v27, %v3559_v59 }
 0x435   :  { %v1791_v15 = vpop.f32.mrf.mxu0 }
 0x436   :  { %1879 = vst [vmem:[%s3698_s9 + $0x98] sm:$0xff] %v1797_v22  ;;  %v1792_v51 = vadd.f32 %v3559_v59, %v1791_v15 }
 0x438   :  { %1878 = vst [vmem:[%s3698_s9 + $0x90] sm:$0xff] %v1792_v51 }
 0x43b   :  { %v2270_v0 = vpop.f32.mrf.mxu0 }
 0x43c   :  { %v1807_v10 = vadd.f32 %v2270_v0, %v3559_v59 }
 0x43d   :  { %v1801_v11 = vpop.f32.mrf.mxu0 }
 0x43e   :  { %1881 = vst [vmem:[%s3698_s9 + $0xa8] sm:$0xff] %v1807_v10  ;;  %v1802_v16 = vadd.f32 %v3559_v59, %v1801_v11 }
 0x440   :  { %1880 = vst [vmem:[%s3698_s9 + $0xa0] sm:$0xff] %v1802_v16 }
 0x443   :  { %v2273_v13 = vpop.f32.mrf.mxu0 }
 0x444   :  { %v1817_v20 = vadd.f32 %v2273_v13, %v3559_v59 }
 0x445   :  { %v1811_v5 = vpop.f32.mrf.mxu0 }
 0x446   :  { %1883 = vst [vmem:[%s3698_s9 + $0xb8] sm:$0xff] %v1817_v20  ;;  %v1812_v37 = vadd.f32 %v3559_v59, %v1811_v5 }
 0x448   :  { %1882 = vst [vmem:[%s3698_s9 + $0xb0] sm:$0xff] %v1812_v37 }
 0x44a   :  { %v2276_v52 = vpop.f32.mrf.mxu0 }
 0x44b   :  { %v1827_v47 = vadd.f32 %v2276_v52, %v3559_v59 }
 0x44c   :  { %v1821_v26 = vpop.f32.mrf.mxu0 }
 0x44d   :  { %1885 = vst [vmem:[%s3698_s9 + $0xc8] sm:$0xff] %v1827_v47  ;;  %v1822_v38 = vadd.f32 %v3559_v59, %v1821_v26 }
 0x44f   :  { %1884 = vst [vmem:[%s3698_s9 + $0xc0] sm:$0xff] %v1822_v38 }
 0x452   :  { %v2279_v19 = vpop.f32.mrf.mxu0 }
 0x453   :  { %v1837_v41 = vadd.f32 %v2279_v19, %v3559_v59 }
 0x454   :  { %v1831_v48 = vpop.f32.mrf.mxu0 }
 0x455   :  { %1887 = vst [vmem:[%s3698_s9 + $0xd8] sm:$0xff] %v1837_v41  ;;  %v1832_v40 = vadd.f32 %v3559_v59, %v1831_v48 }
 0x457   :  { %1886 = vst [vmem:[%s3698_s9 + $0xd0] sm:$0xff] %v1832_v40 }
 0x45a   :  { %v2282_v43 = vpop.f32.mrf.mxu0 }
 0x45b   :  { %v1847_v18 = vadd.f32 %v2282_v43, %v3559_v59 }
 0x45c   :  { %v1841_v50 = vpop.f32.mrf.mxu0 }
 0x45d   :  { %1889 = vst [vmem:[%s3698_s9 + $0xe8] sm:$0xff] %v1847_v18  ;;  %v1842_v42 = vadd.f32 %v3559_v59, %v1841_v50 }
 0x45f   :  { %1888 = vst [vmem:[%s3698_s9 + $0xe0] sm:$0xff] %v1842_v42 }
 0x462   :  { %v2285_v53 = vpop.f32.mrf.mxu0 }
 0x463   :  { %v1857_v1 = vadd.f32 %v2285_v53, %v3559_v59 }
 0x464   :  { %v1851_v32 = vpop.f32.mrf.mxu0 }
 0x465   :  { %1891 = vst [vmem:[%s3698_s9 + $0xf8] sm:$0xff] %v1857_v1  ;;  %v1852_v55 = vadd.f32 %v3559_v59, %v1851_v32 }
 0x467   :  { %1890 = vst [vmem:[%s3698_s9 + $0xf0] sm:$0xff] %v1852_v55 }
 0x468   :  { %1896 = vsyncpa [#allocation3], 1 }

</bundles_post_ra>
